<compile_context>
chip_gen: v7x
topology: tpu7x:2x2x1
jax: 0.10.0
libtpu: 0.0.40
codegen_flags: <defaults>
</compile_context>

<pallas_src>
import functools

import jax
import jax.numpy as jnp
from jax import lax
from jax.experimental import pallas as pl
from jax.experimental.pallas import tpu as pltpu


# --------------------- fused encoder + residual-VQ kernel -------------------
def _dgi_kernel(x_ref, adj_ref, w_ref, b_ref, alpha_ref, cb_ref,
                z_ref, s_ref, zq_ref, idx_ref, loss_ref, sq_ref,
                resid_sc, qsum_sc, idx_sc, loss_sc, *, h_true):
    q = pl.program_id(0)
    nq = pl.num_programs(0)
    M = z_ref.shape[0]          # 2N (positive rows, then corrupted rows)
    N = M // 2
    Qn = idx_sc.shape[1]

    # ---- step 0: GCNConv + PReLU; result seeds the residual chain ----------
    @pl.when(q == 0)
    def _encode():
        # Aggregate-then-project: (adj @ x) @ W  (== adj @ (x @ W), cheaper
        # since F < H).  bf16 MXU operands, f32 accumulation.
        ax_pos = jnp.dot(adj_ref[...], x_ref[pl.ds(0, N), :],
                         preferred_element_type=jnp.float32)
        ax_neg = jnp.dot(adj_ref[...], x_ref[pl.ds(N, N), :],
                         preferred_element_type=jnp.float32)
        ax = jnp.concatenate([ax_pos, ax_neg], axis=0).astype(jnp.bfloat16)
        h = jnp.dot(ax, w_ref[...], preferred_element_type=jnp.float32)
        h = h + b_ref[...]
        z = jnp.where(h > 0.0, h, alpha_ref[...] * h)      # PReLU, per-channel
        z_ref[...] = z
        # DGI summary readout: sigmoid(mean(pos_z, axis=0))
        s_ref[...] = jax.nn.sigmoid(jnp.mean(z[:N], axis=0, keepdims=True))
        resid_sc[...] = z
        qsum_sc[...] = jnp.zeros_like(qsum_sc)
        idx_sc[...] = jnp.zeros_like(idx_sc)
        loss_sc[...] = jnp.zeros_like(loss_sc)

    # ---- residual-VQ step q (residual + accumulator stay resident in VMEM) --
    r = resid_sc[...]                                      # (2N, Hp) f32
    c = cb_ref[...]                                        # (K, Hp) squeezed block
    rn = r * lax.rsqrt(jnp.sum(r * r, axis=1, keepdims=True) + 1e-12)
    cn = c * lax.rsqrt(jnp.sum(c * c, axis=1, keepdims=True) + 1e-12)

    # cosine similarity (2N, K): contract the last dims (no transpose needed)
    sim = lax.dot_general(rn, cn, (((1,), (1,)), ((), ())),
                          preferred_element_type=jnp.float32)
    K = sim.shape[1]
    maxv = jnp.max(sim, axis=1, keepdims=True)
    col = lax.broadcasted_iota(jnp.int32, (M, K), 1)
    # first index achieving the max (torch argmax tie-breaking)
    idx = jnp.min(jnp.where(sim >= maxv, col, K), axis=1, keepdims=True)
    onehot = (col == idx).astype(jnp.float32)
    quant = jnp.dot(onehot, cn, preferred_element_type=jnp.float32)   # (2N, Hp)

    # TODO(synk): reference cosine-sim ResidualVQ implementations normalize the
    # residual before the MSE / residual update; raw-residual semantics of the
    # previous version are kept here.
    d2 = (quant - r) ** 2
    inv = 1.0 / float(N * h_true)            # padded lanes are exactly zero
    loss_pos = jnp.sum(d2[:N]) * inv
    loss_neg = jnp.sum(d2[N:]) * inv

    qsum_sc[...] = qsum_sc[...] + quant
    resid_sc[...] = r - quant

    # scatter this quantizer's indices / losses into column q of the scratch
    qcol = lax.broadcasted_iota(jnp.int32, (M, Qn), 1)
    idx_sc[...] = jnp.where(qcol == q, idx, idx_sc[...])
    lcol = lax.broadcasted_iota(jnp.int32, (2, Qn), 1)
    lrow = lax.broadcasted_iota(jnp.int32, (2, Qn), 0)
    lval = jnp.where(lrow == 0, loss_pos, loss_neg)
    loss_sc[...] = jnp.where(lcol == q, lval, loss_sc[...])

    @pl.when(q == nq - 1)
    def _finalize():
        qs = qsum_sc[...]
        zq_ref[...] = qs
        idx_ref[...] = idx_sc[...]
        loss_ref[...] = loss_sc[...]
        # quantized summary readout: sigmoid(mean(pos_zq, axis=0))
        sq_ref[...] = jax.nn.sigmoid(jnp.mean(qs[:N], axis=0, keepdims=True))


def dgi_fused(x_cat, adj, w, b, alpha, codebooks, *, h_true):
    M, F = x_cat.shape          # M = 2N
    N = adj.shape[0]
    Q, K, Hp = codebooks.shape
    kernel = functools.partial(_dgi_kernel, h_true=h_true)
    cost = pl.CostEstimate(
        flops=int(2 * 2 * N * N * F + 2 * M * F * Hp
                  + Q * (4 * M * K * Hp + 8 * M * Hp)),
        transcendentals=int(Q * (M + K) + 2 * Hp),
        bytes_accessed=int(4 * (M * F + N * N + F * Hp + 2 * Hp + Q * K * Hp
                                + 2 * M * Hp + M * Q + 2 * Q + 2 * Hp)),
    )
    return pl.pallas_call(
        kernel,
        grid=(Q,),
        in_specs=[
            pl.BlockSpec((M, F), lambda q: (0, 0)),           # [x ; x_corrupt]
            pl.BlockSpec((N, N), lambda q: (0, 0)),           # adjacency
            pl.BlockSpec((F, Hp), lambda q: (0, 0)),          # encoder weight
            pl.BlockSpec((1, Hp), lambda q: (0, 0)),          # encoder bias
            pl.BlockSpec((1, Hp), lambda q: (0, 0)),          # PReLU alpha
            pl.BlockSpec((None, K, Hp), lambda q: (q, 0, 0)), # per-q codebook
        ],
        out_specs=[
            pl.BlockSpec((M, Hp), lambda q: (0, 0)),
            pl.BlockSpec((1, Hp), lambda q: (0, 0)),
            pl.BlockSpec((M, Hp), lambda q: (0, 0)),
            pl.BlockSpec((M, Q), lambda q: (0, 0)),
            pl.BlockSpec((2, Q), lambda q: (0, 0)),
            pl.BlockSpec((1, Hp), lambda q: (0, 0)),
        ],
        out_shape=(
            jax.ShapeDtypeStruct((M, Hp), jnp.float32),   # z (pos ; corrupted)
            jax.ShapeDtypeStruct((1, Hp), jnp.float32),   # sigmoid(mean(pos_z))
            jax.ShapeDtypeStruct((M, Hp), jnp.float32),   # quantized z
            jax.ShapeDtypeStruct((M, Q), jnp.int32),      # codebook indices
            jax.ShapeDtypeStruct((2, Q), jnp.float32),    # [pos; neg] commit loss / q
            jax.ShapeDtypeStruct((1, Hp), jnp.float32),   # sigmoid(mean(pos_zq))
        ),
        scratch_shapes=[
            pltpu.VMEM((M, Hp), jnp.float32),   # residual
            pltpu.VMEM((M, Hp), jnp.float32),   # quantized accumulator
            pltpu.VMEM((M, Q), jnp.int32),      # index accumulator
            pltpu.VMEM((2, Q), jnp.float32),    # loss accumulator
        ],
        compiler_params=pltpu.CompilerParams(
            dimension_semantics=("arbitrary",),
        ),
        cost_estimate=cost,
    )(x_cat, adj, w, b, alpha, codebooks)


# ----------------------------- DGI forward -----------------------------------
def dgi_forward(params, x, adj, perm):
    N, F = x.shape
    H = params["w_enc"].shape[1]
    Q, K, _ = params["codebooks"].shape
    Hp = ((H + 127) // 128) * 128      # pad hidden dim to full 128-lane tiles

    # corruption: shuffle node features, keep graph structure; batch pos + neg
    # TODO(synk): the gather/concat could move in-kernel via a scalar-prefetched
    # perm and Element-indexed BlockSpec; kept in the wrapper since F is small.
    x_cat = jnp.concatenate([x, x[perm]], axis=0).astype(jnp.bfloat16)   # (2N, F)
    adj_b = adj.astype(jnp.bfloat16)

    # lane-pad parameters so every kernel store is lane-dense (128 lanes)
    w_p = jnp.zeros((F, Hp), jnp.bfloat16).at[:, :H].set(
        params["w_enc"].astype(jnp.bfloat16))
    b_p = jnp.zeros((1, Hp), jnp.float32).at[:, :H].set(params["b_enc"])
    a_p = jnp.zeros((1, Hp), jnp.float32).at[:, :H].set(params["alpha"])
    cb_p = jnp.zeros((Q, K, Hp), jnp.float32).at[:, :, :H].set(params["codebooks"])

    z, s, zq, idx, commit, sq = dgi_fused(
        x_cat, adj_b, w_p, b_p, a_p, cb_p, h_true=H)

    pos_z, neg_z = z[:N, :H], z[N:, :H]
    pos_zq, neg_zq = zq[:N, :H], zq[N:, :H]
    pos_idx = idx[:N]                                     # (N, Q)
    return (pos_z, neg_z, s[0, :H], pos_zq, neg_zq, sq[0, :H],
            jnp.sum(commit[0]), jnp.sum(commit[1]), pos_idx)


if __name__ == "__main__":
    key = jax.random.PRNGKey(0)
    N, F, H = 32, 16, 32          # nodes, input features, hidden_channels (= vq_dim)
    Q, K = 2, 64                  # vq_num_codebook, vq_codebook_size
    ks = jax.random.split(key, 8)

    x = jax.random.normal(ks[0], (N, F), jnp.float32)
    # random symmetric adjacency with self-loops, GCN symmetric normalization
    a = (jax.random.uniform(ks[1], (N, N)) < 0.2).astype(jnp.float32)
    a = jnp.maximum(a, a.T) + jnp.eye(N, dtype=jnp.float32)
    dinv = lax.rsqrt(jnp.sum(a, axis=1, keepdims=True))
    adj = dinv * a * dinv.T

    bound = 1.0 / float(jnp.sqrt(jnp.float32(H)))
    params = {
        "w_enc": jax.random.normal(ks[2], (F, H), jnp.float32) * 0.1,
        "b_enc": jnp.zeros((1, H), jnp.float32),
        # PReLU(hidden_channels): per-channel slope, default 0.25
        "alpha": jnp.full((1, H), 0.25, jnp.float32),
        # TODO(synk): ResidualVQ kmeans_init is a data-dependent training-time
        # procedure; codebooks here are fixed deterministic parameters.
        "codebooks": jax.random.normal(ks[3], (Q, K, H), jnp.float32),
        # DGI discriminator weight (hidden x hidden); part of the module's
        # parameters but not used by this forward().
        "weight": jax.random.uniform(ks[4], (H, H), jnp.float32, -bound, bound),
    }
    perm = jax.random.permutation(ks[5], N)

    fwd = jax.jit(dgi_forward)
    outs = fwd(params, x, adj, perm)
    outs = jax.block_until_ready(outs)
    print("KERNEL_OK")
</pallas_src>

<mosaic_0001>
module attributes {stable_mosaic.version = 11 : i64} {
  func.func @_dgi_kernel(%arg0: i32, %arg1: memref<64x16xbf16, #tpu.memory_space<vmem>>, %arg2: memref<32x32xbf16, #tpu.memory_space<vmem>>, %arg3: memref<16x128xbf16, #tpu.memory_space<vmem>>, %arg4: memref<1x128xf32, #tpu.memory_space<vmem>>, %arg5: memref<1x128xf32, #tpu.memory_space<vmem>>, %arg6: memref<1x64x128xf32, #tpu.memory_space<vmem>>, %arg7: memref<64x128xf32, #tpu.memory_space<vmem>>, %arg8: memref<1x128xf32, #tpu.memory_space<vmem>>, %arg9: memref<64x128xf32, #tpu.memory_space<vmem>>, %arg10: memref<64x2xi32, #tpu.memory_space<vmem>>, %arg11: memref<2x2xf32, #tpu.memory_space<vmem>>, %arg12: memref<1x128xf32, #tpu.memory_space<vmem>>, %arg13: memref<64x128xf32, #tpu.memory_space<vmem>>, %arg14: memref<64x128xf32, #tpu.memory_space<vmem>>, %arg15: memref<64x2xi32, #tpu.memory_space<vmem>>, %arg16: memref<2x2xf32, #tpu.memory_space<vmem>>) attributes {dimension_semantics = [#tpu.dimension_semantics<arbitrary>], iteration_bounds = array<i64: 2>, scalar_prefetch = 0 : i64, scratch_operands = 4 : i64, tpu.core_type = #tpu.core_type<tc>, window_params = [{pipeline_mode = #tpu.pipeline_mode<synchronous>, transform_indices = @transform_0, window_bounds = array<i64: 64, 16>}, {pipeline_mode = #tpu.pipeline_mode<synchronous>, transform_indices = @transform_1, window_bounds = array<i64: 32, 32>}, {pipeline_mode = #tpu.pipeline_mode<synchronous>, transform_indices = @transform_2, window_bounds = array<i64: 16, 128>}, {pipeline_mode = #tpu.pipeline_mode<synchronous>, transform_indices = @transform_3, window_bounds = array<i64: 1, 128>}, {pipeline_mode = #tpu.pipeline_mode<synchronous>, transform_indices = @transform_4, window_bounds = array<i64: 1, 128>}, {transform_indices = @transform_5, window_bounds = array<i64: 1, 64, 128>}, {pipeline_mode = #tpu.pipeline_mode<synchronous>, transform_indices = @transform_6, window_bounds = array<i64: 64, 128>}, {pipeline_mode = #tpu.pipeline_mode<synchronous>, transform_indices = @transform_7, window_bounds = array<i64: 1, 128>}, {pipeline_mode = #tpu.pipeline_mode<synchronous>, transform_indices = @transform_8, window_bounds = array<i64: 64, 128>}, {pipeline_mode = #tpu.pipeline_mode<synchronous>, transform_indices = @transform_9, window_bounds = array<i64: 64, 2>}, {pipeline_mode = #tpu.pipeline_mode<synchronous>, transform_indices = @transform_10, window_bounds = array<i64: 2, 2>}, {pipeline_mode = #tpu.pipeline_mode<synchronous>, transform_indices = @transform_11, window_bounds = array<i64: 1, 128>}]} {
    %c0_i32 = arith.constant 0 : i32
    %0 = arith.cmpi eq, %arg0, %c0_i32 : i32
    %1 = arith.extui %0 : i1 to i32
    %c0_i32_0 = arith.constant 0 : i32
    %2 = arith.cmpi ne, %1, %c0_i32_0 : i32
    scf.if %2 {
      %c0_32 = arith.constant 0 : index
      %c0_33 = arith.constant 0 : index
      %79 = vector.load %arg2[%c0_32, %c0_33] : memref<32x32xbf16, #tpu.memory_space<vmem>>, vector<32x32xbf16>
      %c0_34 = arith.constant 0 : index
      %c0_35 = arith.constant 0 : index
      %80 = vector.load %arg1[%c0_34, %c0_35] : memref<64x16xbf16, #tpu.memory_space<vmem>>, vector<32x16xbf16>
      %cst_36 = arith.constant dense<0.000000e+00> : vector<32x16xf32>
      %81 = tpu.matmul %79, %80, %cst_36 {dimension_numbers = #tpu.dot_dimension_numbers<[1], [0], [0], [1], [0, 0, 1, 1], [], []>} : vector<32x32xbf16>, vector<32x16xbf16>, vector<32x16xf32> -> vector<32x16xf32>
      %c0_37 = arith.constant 0 : index
      %c0_38 = arith.constant 0 : index
      %82 = vector.load %arg2[%c0_37, %c0_38] : memref<32x32xbf16, #tpu.memory_space<vmem>>, vector<32x32xbf16>
      %c32 = arith.constant 32 : index
      %c0_39 = arith.constant 0 : index
      %83 = vector.load %arg1[%c32, %c0_39] : memref<64x16xbf16, #tpu.memory_space<vmem>>, vector<32x16xbf16>
      %cst_40 = arith.constant dense<0.000000e+00> : vector<32x16xf32>
      %84 = tpu.matmul %82, %83, %cst_40 {dimension_numbers = #tpu.dot_dimension_numbers<[1], [0], [0], [1], [0, 0, 1, 1], [], []>} : vector<32x32xbf16>, vector<32x16xbf16>, vector<32x16xf32> -> vector<32x16xf32>
      %85 = tpu.concatenate %81, %84 in 0 : vector<32x16xf32>, vector<32x16xf32> -> vector<64x16xf32>
      %86 = arith.truncf %85 : vector<64x16xf32> to vector<64x16xbf16>
      %c0_41 = arith.constant 0 : index
      %c0_42 = arith.constant 0 : index
      %87 = vector.load %arg3[%c0_41, %c0_42] : memref<16x128xbf16, #tpu.memory_space<vmem>>, vector<16x128xbf16>
      %cst_43 = arith.constant dense<0.000000e+00> : vector<64x128xf32>
      %88 = tpu.matmul %86, %87, %cst_43 {dimension_numbers = #tpu.dot_dimension_numbers<[1], [0], [0], [1], [0, 0, 1, 1], [], []>} : vector<64x16xbf16>, vector<16x128xbf16>, vector<64x128xf32> -> vector<64x128xf32>
      %c0_44 = arith.constant 0 : index
      %c0_45 = arith.constant 0 : index
      %89 = vector.load %arg4[%c0_44, %c0_45] : memref<1x128xf32, #tpu.memory_space<vmem>>, vector<1x128xf32>
      %90 = vector.broadcast %89 : vector<1x128xf32> to vector<64x128xf32>
      %91 = arith.addf %88, %90 : vector<64x128xf32>
      %cst_46 = arith.constant 0.000000e+00 : f32
      %92 = vector.broadcast %cst_46 : f32 to vector<64x128xf32>
      %93 = arith.cmpf ogt, %91, %92 : vector<64x128xf32>
      %c0_47 = arith.constant 0 : index
      %c0_48 = arith.constant 0 : index
      %94 = vector.load %arg5[%c0_47, %c0_48] : memref<1x128xf32, #tpu.memory_space<vmem>>, vector<1x128xf32>
      %95 = vector.broadcast %94 : vector<1x128xf32> to vector<64x128xf32>
      %96 = arith.mulf %95, %91 : vector<64x128xf32>
      %97 = arith.select %93, %91, %96 : vector<64x128xi1>, vector<64x128xf32>
      %c0_49 = arith.constant 0 : index
      %c0_50 = arith.constant 0 : index
      %98 = vector.load %arg7[%c0_49, %c0_50] : memref<64x128xf32, #tpu.memory_space<vmem>>, vector<64x128xf32>
      tpu.vector_store %arg7[%c0_49, %c0_50], %97 {strides = array<i32>} : memref<64x128xf32, #tpu.memory_space<vmem>>, vector<64x128xf32>,
      %99 = vector.extract_strided_slice %97 {offsets = [0, 0], sizes = [32, 128], strides = [1, 1]} : vector<64x128xf32> to vector<32x128xf32>
      %cst_51 = arith.constant dense<0.000000e+00> : vector<128xf32>
      %100 = vector.multi_reduction <add>, %99, %cst_51 [0] : vector<32x128xf32> to vector<128xf32>
      %101 = vector.shape_cast %100 : vector<128xf32> to vector<1x128xf32>
      %cst_52 = arith.constant 3.200000e+01 : f32
      %102 = vector.broadcast %cst_52 : f32 to vector<1x128xf32>
      %103 = arith.divf %101, %102 : vector<1x128xf32>
      %104 = arith.negf %103 : vector<1x128xf32>
      %105 = math.exp %104 : vector<1x128xf32>
      %cst_53 = arith.constant 1.000000e+00 : f32
      %106 = vector.broadcast %cst_53 : f32 to vector<1x128xf32>
      %107 = arith.addf %106, %105 : vector<1x128xf32>
      %108 = arith.divf %106, %107 : vector<1x128xf32>
      %c0_54 = arith.constant 0 : index
      %c0_55 = arith.constant 0 : index
      %109 = vector.load %arg8[%c0_54, %c0_55] : memref<1x128xf32, #tpu.memory_space<vmem>>, vector<1x128xf32>
      tpu.vector_store %arg8[%c0_54, %c0_55], %108 {strides = array<i32>} : memref<1x128xf32, #tpu.memory_space<vmem>>, vector<1x128xf32>,
      %c0_56 = arith.constant 0 : index
      %c0_57 = arith.constant 0 : index
      %110 = vector.load %arg13[%c0_56, %c0_57] : memref<64x128xf32, #tpu.memory_space<vmem>>, vector<64x128xf32>
      tpu.vector_store %arg13[%c0_56, %c0_57], %97 {strides = array<i32>} : memref<64x128xf32, #tpu.memory_space<vmem>>, vector<64x128xf32>,
      %cst_58 = arith.constant 0.000000e+00 : f32
      %111 = vector.broadcast %cst_58 : f32 to vector<64x128xf32>
      %c0_59 = arith.constant 0 : index
      %c0_60 = arith.constant 0 : index
      %112 = vector.load %arg14[%c0_59, %c0_60] : memref<64x128xf32, #tpu.memory_space<vmem>>, vector<64x128xf32>
      tpu.vector_store %arg14[%c0_59, %c0_60], %111 {strides = array<i32>} : memref<64x128xf32, #tpu.memory_space<vmem>>, vector<64x128xf32>,
      %c0_i32_61 = arith.constant 0 : i32
      %113 = vector.broadcast %c0_i32_61 : i32 to vector<64x2xi32>
      %c0_62 = arith.constant 0 : index
      %c0_63 = arith.constant 0 : index
      %114 = vector.load %arg15[%c0_62, %c0_63] : memref<64x2xi32, #tpu.memory_space<vmem>>, vector<64x2xi32>
      tpu.vector_store %arg15[%c0_62, %c0_63], %113 {strides = array<i32>} : memref<64x2xi32, #tpu.memory_space<vmem>>, vector<64x2xi32>,
      %cst_64 = arith.constant 0.000000e+00 : f32
      %115 = vector.broadcast %cst_64 : f32 to vector<2x2xf32>
      %c0_65 = arith.constant 0 : index
      %c0_66 = arith.constant 0 : index
      %116 = vector.load %arg16[%c0_65, %c0_66] : memref<2x2xf32, #tpu.memory_space<vmem>>, vector<2x2xf32>
      tpu.vector_store %arg16[%c0_65, %c0_66], %115 {strides = array<i32>} : memref<2x2xf32, #tpu.memory_space<vmem>>, vector<2x2xf32>,
    } else {
    }
    %c0 = arith.constant 0 : index
    %c0_1 = arith.constant 0 : index
    %3 = vector.load %arg13[%c0, %c0_1] : memref<64x128xf32, #tpu.memory_space<vmem>>, vector<64x128xf32>
    %c0_2 = arith.constant 0 : index
    %c0_3 = arith.constant 0 : index
    %c0_4 = arith.constant 0 : index
    %4 = vector.load %arg6[%c0_2, %c0_3, %c0_4] : memref<1x64x128xf32, #tpu.memory_space<vmem>>, vector<1x64x128xf32>
    %5 = vector.shape_cast %4 : vector<1x64x128xf32> to vector<64x128xf32>
    %6 = arith.mulf %3, %3 : vector<64x128xf32>
    %cst = arith.constant dense<0.000000e+00> : vector<64xf32>
    %7 = vector.multi_reduction <add>, %6, %cst [1] : vector<64x128xf32> to vector<64xf32>
    %8 = vector.shape_cast %7 : vector<64xf32> to vector<64x1xf32>
    %cst_5 = arith.constant 9.99999996E-13 : f32
    %9 = vector.broadcast %cst_5 : f32 to vector<64x1xf32>
    %10 = arith.addf %8, %9 : vector<64x1xf32>
    %11 = math.rsqrt %10 : vector<64x1xf32>
    %12 = vector.broadcast %11 : vector<64x1xf32> to vector<64x128xf32>
    %13 = arith.mulf %3, %12 : vector<64x128xf32>
    %14 = arith.mulf %5, %5 : vector<64x128xf32>
    %cst_6 = arith.constant dense<0.000000e+00> : vector<64xf32>
    %15 = vector.multi_reduction <add>, %14, %cst_6 [1] : vector<64x128xf32> to vector<64xf32>
    %16 = vector.shape_cast %15 : vector<64xf32> to vector<64x1xf32>
    %cst_7 = arith.constant 9.99999996E-13 : f32
    %17 = vector.broadcast %cst_7 : f32 to vector<64x1xf32>
    %18 = arith.addf %16, %17 : vector<64x1xf32>
    %19 = math.rsqrt %18 : vector<64x1xf32>
    %20 = vector.broadcast %19 : vector<64x1xf32> to vector<64x128xf32>
    %21 = arith.mulf %5, %20 : vector<64x128xf32>
    %cst_8 = arith.constant dense<0.000000e+00> : vector<64x64xf32>
    %22 = tpu.matmul %13, %21, %cst_8 {dimension_numbers = #tpu.dot_dimension_numbers<[1], [1], [0], [0], [0, 0, 1, 0], [], []>} : vector<64x128xf32>, vector<64x128xf32>, vector<64x64xf32> -> vector<64x64xf32>
    %cst_9 = arith.constant dense<0xFF800000> : vector<64xf32>
    %23 = vector.multi_reduction <maximumf>, %22, %cst_9 [1] : vector<64x64xf32> to vector<64xf32>
    %24 = vector.shape_cast %23 : vector<64xf32> to vector<64x1xf32>
    %25 = tpu.iota {dimensions = array<i32: 1>} : vector<64x64xi32>
    %26 = vector.broadcast %24 : vector<64x1xf32> to vector<64x64xf32>
    %27 = arith.cmpf oge, %22, %26 : vector<64x64xf32>
    %c64_i32 = arith.constant 64 : i32
    %28 = vector.broadcast %c64_i32 : i32 to vector<64x64xi32>
    %29 = arith.select %27, %25, %28 : vector<64x64xi1>, vector<64x64xi32>
    %cst_10 = arith.constant dense<2147483647> : vector<64xi32>
    %30 = vector.multi_reduction <minsi>, %29, %cst_10 [1] : vector<64x64xi32> to vector<64xi32>
    %31 = vector.shape_cast %30 : vector<64xi32> to vector<64x1xi32>
    %32 = vector.broadcast %31 : vector<64x1xi32> to vector<64x64xi32>
    %33 = arith.cmpi eq, %25, %32 : vector<64x64xi32>
    %34 = arith.extui %33 : vector<64x64xi1> to vector<64x64xi32>
    %35 = arith.sitofp %34 : vector<64x64xi32> to vector<64x64xf32>
    %cst_11 = arith.constant dense<0.000000e+00> : vector<64x128xf32>
    %36 = tpu.matmul %35, %21, %cst_11 {dimension_numbers = #tpu.dot_dimension_numbers<[1], [0], [0], [1], [0, 0, 1, 1], [], []>} : vector<64x64xf32>, vector<64x128xf32>, vector<64x128xf32> -> vector<64x128xf32>
    %37 = arith.subf %36, %3 : vector<64x128xf32>
    %38 = arith.mulf %37, %37 : vector<64x128xf32>
    %39 = vector.extract_strided_slice %38 {offsets = [0, 0], sizes = [32, 128], strides = [1, 1]} : vector<64x128xf32> to vector<32x128xf32>
    %40 = vector.shape_cast %39 : vector<32x128xf32> to vector<1x32x128xf32>
    %cst_12 = arith.constant dense<0.000000e+00> : vector<1xf32>
    %41 = vector.multi_reduction <add>, %40, %cst_12 [1, 2] : vector<1x32x128xf32> to vector<1xf32>
    %42 = vector.shape_cast %41 : vector<1xf32> to vector<1x1x1xf32>
    %43 = vector.extract %42[0, 0, 0] : f32 from vector<1x1x1xf32>
    %cst_13 = arith.constant 9.765625E-4 : f32
    %44 = arith.mulf %43, %cst_13 : f32
    %45 = vector.extract_strided_slice %38 {offsets = [32, 0], sizes = [32, 128], strides = [1, 1]} : vector<64x128xf32> to vector<32x128xf32>
    %46 = vector.shape_cast %45 : vector<32x128xf32> to vector<1x32x128xf32>
    %cst_14 = arith.constant dense<0.000000e+00> : vector<1xf32>
    %47 = vector.multi_reduction <add>, %46, %cst_14 [1, 2] : vector<1x32x128xf32> to vector<1xf32>
    %48 = vector.shape_cast %47 : vector<1xf32> to vector<1x1x1xf32>
    %49 = vector.extract %48[0, 0, 0] : f32 from vector<1x1x1xf32>
    %cst_15 = arith.constant 9.765625E-4 : f32
    %50 = arith.mulf %49, %cst_15 : f32
    %c0_16 = arith.constant 0 : index
    %c0_17 = arith.constant 0 : index
    %51 = vector.load %arg14[%c0_16, %c0_17] : memref<64x128xf32, #tpu.memory_space<vmem>>, vector<64x128xf32>
    %52 = arith.addf %51, %36 : vector<64x128xf32>
    %c0_18 = arith.constant 0 : index
    %c0_19 = arith.constant 0 : index
    %53 = vector.load %arg14[%c0_18, %c0_19] : memref<64x128xf32, #tpu.memory_space<vmem>>, vector<64x128xf32>
    tpu.vector_store %arg14[%c0_18, %c0_19], %52 {strides = array<i32>} : memref<64x128xf32, #tpu.memory_space<vmem>>, vector<64x128xf32>,
    %54 = arith.subf %3, %36 : vector<64x128xf32>
    %c0_20 = arith.constant 0 : index
    %c0_21 = arith.constant 0 : index
    %55 = vector.load %arg13[%c0_20, %c0_21] : memref<64x128xf32, #tpu.memory_space<vmem>>, vector<64x128xf32>
    tpu.vector_store %arg13[%c0_20, %c0_21], %54 {strides = array<i32>} : memref<64x128xf32, #tpu.memory_space<vmem>>, vector<64x128xf32>,
    %56 = tpu.iota {dimensions = array<i32: 1>} : vector<64x2xi32>
    %57 = vector.broadcast %arg0 : i32 to vector<64x2xi32>
    %58 = arith.cmpi eq, %56, %57 : vector<64x2xi32>
    %c0_22 = arith.constant 0 : index
    %c0_23 = arith.constant 0 : index
    %59 = vector.load %arg15[%c0_22, %c0_23] : memref<64x2xi32, #tpu.memory_space<vmem>>, vector<64x2xi32>
    %60 = vector.shape_cast %31 : vector<64x1xi32> to vector<64x1xi32>
    %61 = vector.broadcast %60 : vector<64x1xi32> to vector<64x2xi32>
    %62 = arith.select %58, %61, %59 : vector<64x2xi1>, vector<64x2xi32>
    %c0_24 = arith.constant 0 : index
    %c0_25 = arith.constant 0 : index
    %63 = vector.load %arg15[%c0_24, %c0_25] : memref<64x2xi32, #tpu.memory_space<vmem>>, vector<64x2xi32>
    tpu.vector_store %arg15[%c0_24, %c0_25], %62 {strides = array<i32>} : memref<64x2xi32, #tpu.memory_space<vmem>>, vector<64x2xi32>,
    %64 = tpu.iota {dimensions = array<i32: 1>} : vector<2x2xi32>
    %65 = tpu.iota {dimensions = array<i32: 0>} : vector<2x2xi32>
    %c0_i32_26 = arith.constant 0 : i32
    %66 = vector.broadcast %c0_i32_26 : i32 to vector<2x2xi32>
    %67 = arith.cmpi eq, %65, %66 : vector<2x2xi32>
    %68 = vector.broadcast %44 : f32 to vector<2x2xf32>
    %69 = vector.broadcast %50 : f32 to vector<2x2xf32>
    %70 = arith.select %67, %68, %69 : vector<2x2xi1>, vector<2x2xf32>
    %71 = vector.broadcast %arg0 : i32 to vector<2x2xi32>
    %72 = arith.cmpi eq, %64, %71 : vector<2x2xi32>
    %c0_27 = arith.constant 0 : index
    %c0_28 = arith.constant 0 : index
    %73 = vector.load %arg16[%c0_27, %c0_28] : memref<2x2xf32, #tpu.memory_space<vmem>>, vector<2x2xf32>
    %74 = arith.select %72, %70, %73 : vector<2x2xi1>, vector<2x2xf32>
    %c0_29 = arith.constant 0 : index
    %c0_30 = arith.constant 0 : index
    %75 = vector.load %arg16[%c0_29, %c0_30] : memref<2x2xf32, #tpu.memory_space<vmem>>, vector<2x2xf32>
    tpu.vector_store %arg16[%c0_29, %c0_30], %74 {strides = array<i32>} : memref<2x2xf32, #tpu.memory_space<vmem>>, vector<2x2xf32>,
    %c1_i32 = arith.constant 1 : i32
    %76 = arith.cmpi eq, %arg0, %c1_i32 : i32
    %77 = arith.extui %76 : i1 to i32
    %c0_i32_31 = arith.constant 0 : i32
    %78 = arith.cmpi ne, %77, %c0_i32_31 : i32
    scf.if %78 {
      %c0_32 = arith.constant 0 : index
      %c0_33 = arith.constant 0 : index
      %79 = vector.load %arg14[%c0_32, %c0_33] : memref<64x128xf32, #tpu.memory_space<vmem>>, vector<64x128xf32>
      %c0_34 = arith.constant 0 : index
      %c0_35 = arith.constant 0 : index
      %80 = vector.load %arg9[%c0_34, %c0_35] : memref<64x128xf32, #tpu.memory_space<vmem>>, vector<64x128xf32>
      tpu.vector_store %arg9[%c0_34, %c0_35], %79 {strides = array<i32>} : memref<64x128xf32, #tpu.memory_space<vmem>>, vector<64x128xf32>,
      %c0_36 = arith.constant 0 : index
      %c0_37 = arith.constant 0 : index
      %81 = vector.load %arg15[%c0_36, %c0_37] : memref<64x2xi32, #tpu.memory_space<vmem>>, vector<64x2xi32>
      %c0_38 = arith.constant 0 : index
      %c0_39 = arith.constant 0 : index
      %82 = vector.load %arg10[%c0_38, %c0_39] : memref<64x2xi32, #tpu.memory_space<vmem>>, vector<64x2xi32>
      tpu.vector_store %arg10[%c0_38, %c0_39], %81 {strides = array<i32>} : memref<64x2xi32, #tpu.memory_space<vmem>>, vector<64x2xi32>,
      %c0_40 = arith.constant 0 : index
      %c0_41 = arith.constant 0 : index
      %83 = vector.load %arg16[%c0_40, %c0_41] : memref<2x2xf32, #tpu.memory_space<vmem>>, vector<2x2xf32>
      %c0_42 = arith.constant 0 : index
      %c0_43 = arith.constant 0 : index
      %84 = vector.load %arg11[%c0_42, %c0_43] : memref<2x2xf32, #tpu.memory_space<vmem>>, vector<2x2xf32>
      tpu.vector_store %arg11[%c0_42, %c0_43], %83 {strides = array<i32>} : memref<2x2xf32, #tpu.memory_space<vmem>>, vector<2x2xf32>,
      %85 = vector.extract_strided_slice %79 {offsets = [0, 0], sizes = [32, 128], strides = [1, 1]} : vector<64x128xf32> to vector<32x128xf32>
      %cst_44 = arith.constant dense<0.000000e+00> : vector<128xf32>
      %86 = vector.multi_reduction <add>, %85, %cst_44 [0] : vector<32x128xf32> to vector<128xf32>
      %87 = vector.shape_cast %86 : vector<128xf32> to vector<1x128xf32>
      %cst_45 = arith.constant 3.200000e+01 : f32
      %88 = vector.broadcast %cst_45 : f32 to vector<1x128xf32>
      %89 = arith.divf %87, %88 : vector<1x128xf32>
      %90 = arith.negf %89 : vector<1x128xf32>
      %91 = math.exp %90 : vector<1x128xf32>
      %cst_46 = arith.constant 1.000000e+00 : f32
      %92 = vector.broadcast %cst_46 : f32 to vector<1x128xf32>
      %93 = arith.addf %92, %91 : vector<1x128xf32>
      %94 = arith.divf %92, %93 : vector<1x128xf32>
      %c0_47 = arith.constant 0 : index
      %c0_48 = arith.constant 0 : index
      %95 = vector.load %arg12[%c0_47, %c0_48] : memref<1x128xf32, #tpu.memory_space<vmem>>, vector<1x128xf32>
      tpu.vector_store %arg12[%c0_47, %c0_48], %94 {strides = array<i32>} : memref<1x128xf32, #tpu.memory_space<vmem>>, vector<1x128xf32>,
    } else {
    }
    return
  }
  func.func @transform_0(%arg0: i32) -> (i32, i32) {
    %c0_i32 = arith.constant 0 : i32
    %c0_i32_0 = arith.constant 0 : i32
    %c0_i32_1 = arith.constant 0 : i32
    return %c0_i32, %c0_i32_0 : i32, i32
  }
  func.func @transform_1(%arg0: i32) -> (i32, i32) {
    %c0_i32 = arith.constant 0 : i32
    %c0_i32_0 = arith.constant 0 : i32
    %c0_i32_1 = arith.constant 0 : i32
    return %c0_i32, %c0_i32_0 : i32, i32
  }
  func.func @transform_2(%arg0: i32) -> (i32, i32) {
    %c0_i32 = arith.constant 0 : i32
    %c0_i32_0 = arith.constant 0 : i32
    %c0_i32_1 = arith.constant 0 : i32
    return %c0_i32, %c0_i32_0 : i32, i32
  }
  func.func @transform_3(%arg0: i32) -> (i32, i32) {
    %c0_i32 = arith.constant 0 : i32
    %c0_i32_0 = arith.constant 0 : i32
    %c0_i32_1 = arith.constant 0 : i32
    return %c0_i32, %c0_i32_0 : i32, i32
  }
  func.func @transform_4(%arg0: i32) -> (i32, i32) {
    %c0_i32 = arith.constant 0 : i32
    %c0_i32_0 = arith.constant 0 : i32
    %c0_i32_1 = arith.constant 0 : i32
    return %c0_i32, %c0_i32_0 : i32, i32
  }
  func.func @transform_5(%arg0: i32) -> (i32, i32, i32) {
    %c0_i32 = arith.constant 0 : i32
    %c0_i32_0 = arith.constant 0 : i32
    %c0_i32_1 = arith.constant 0 : i32
    return %arg0, %c0_i32, %c0_i32_0 : i32, i32, i32
  }
  func.func @transform_6(%arg0: i32) -> (i32, i32) {
    %c0_i32 = arith.constant 0 : i32
    %c0_i32_0 = arith.constant 0 : i32
    %c0_i32_1 = arith.constant 0 : i32
    return %c0_i32, %c0_i32_0 : i32, i32
  }
  func.func @transform_7(%arg0: i32) -> (i32, i32) {
    %c0_i32 = arith.constant 0 : i32
    %c0_i32_0 = arith.constant 0 : i32
    %c0_i32_1 = arith.constant 0 : i32
    return %c0_i32, %c0_i32_0 : i32, i32
  }
  func.func @transform_8(%arg0: i32) -> (i32, i32) {
    %c0_i32 = arith.constant 0 : i32
    %c0_i32_0 = arith.constant 0 : i32
    %c0_i32_1 = arith.constant 0 : i32
    return %c0_i32, %c0_i32_0 : i32, i32
  }
  func.func @transform_9(%arg0: i32) -> (i32, i32) {
    %c0_i32 = arith.constant 0 : i32
    %c0_i32_0 = arith.constant 0 : i32
    %c0_i32_1 = arith.constant 0 : i32
    return %c0_i32, %c0_i32_0 : i32, i32
  }
  func.func @transform_10(%arg0: i32) -> (i32, i32) {
    %c0_i32 = arith.constant 0 : i32
    %c0_i32_0 = arith.constant 0 : i32
    %c0_i32_1 = arith.constant 0 : i32
    return %c0_i32, %c0_i32_0 : i32, i32
  }
  func.func @transform_11(%arg0: i32) -> (i32, i32) {
    %c0_i32 = arith.constant 0 : i32
    %c0_i32_0 = arith.constant 0 : i32
    %c0_i32_1 = arith.constant 0 : i32
    return %c0_i32, %c0_i32_0 : i32, i32
  }
}

</mosaic_0001>

<bundles_post_ra>
// kernel: dgi_forward.1
= control target key start
LH: loop header
LB: loop body
LE: loop exit
PB: predicated region body
PF: predicated region fallthrough
CT: control target
= control target key end

     0   :  { %s1799_s17 = smov 0   ;;  %s2142_s0 = inlined_call_operand.vmem [shape: bf16[64,16], index: 0, kind: input, shape index: {}]   ;;  %s2143_s1 = inlined_call_operand.vmem [shape: bf16[32,32], index: 1, kind: input, shape index: {}]   ;;  %s2144_s2 = inlined_call_operand.vmem [shape: bf16[16,128], index: 2, kind: input, shape index: {}]   ;;  %s2145_s3 = inlined_call_operand.vmem [shape: f32[1,128], index: 3, kind: input, shape index: {}]   ;;  %s2146_s4 = inlined_call_operand.vmem [shape: f32[1,128], index: 4, kind: input, shape index: {}]   ;;  %s2147_s5 = inlined_call_operand.vmem [shape: f32[2,64,128], index: 5, kind: input, shape index: {}]   ;;  %s2148_s6 = inlined_call_operand.vmem [shape: f32[64,128], index: 6, kind: output, shape index: {0}]   ;;  %s2149_s7 = inlined_call_operand.vmem [shape: f32[1,128], index: 7, kind: output, shape index: {1}]   ;;  %s2150_s8 = inlined_call_operand.vmem [shape: f32[64,128], index: 8, kind: output, shape index: {2}]   ;;  %s2151_s9 = inlined_call_operand.vmem [shape: s32[64,2], index: 9, kind: output, shape index: {3}]   ;;  %s2152_s10 = inlined_call_operand.vmem [shape: f32[2,2], index: 10, kind: output, shape index: {4}]   ;;  %s2153_s11 = inlined_call_operand.vmem [shape: f32[1,128], index: 11, kind: output, shape index: {5}]  }
   0x1 LB: > { %s1805_s18 = sadd.s32 4294967295, %s1734_s17   ;;  %p1464_p0 = scmp.ge.s32.totalorder %s1734_s17, 1  ;;  %s1734_s17 = sphi %s1799_s17, %s22_s17  }
   0x2   : > { %p318_p1 = scmp.lt.s32.totalorder %s1734_s17, 3 }
   0x4   : > { %p319_p2 = pnand %p1464_p0, %p318_p1 }
   0x5   : > { %p353_p3 = scmp.lt.s32.totalorder (!%p319_p2), %s1805_s18, 1  ;;  %p1467_p4 = scmp.ne.s32.totalorder (!%p319_p2), %s1805_s18, 0 }
   0x6   : > { %322 = sbr.rel (%p319_p2) target bundleno = 1813 (0x715), region = 44 }
   0xd   : > { %s354_s19 = scalar_select %p353_p3, %s1805_s18, 1 }
   0xe   : > { %362 = sbr.rel (%p1467_p4) target bundleno = 508 (0x1fc), region = 48  ;;  %v1681_v0 = vld [vmem:[%s2142_s0] sm:$0xff] (!%p1467_p4)   ;;  %v1682_v1 = vld [vmem:[%s2142_s0 + $0x8] sm:$0xff] (!%p1467_p4)   ;;  %vm393_vm0 = vcmask (!%p1467_p4), 261120   ;;  %v1685_v3 = vld [vmem:[%s2142_s0 + $0x10] sm:$0xff] (!%p1467_p4)   ;;  %vm533_vm1 = vcmask (!%p1467_p4), 130048  }
   0xf   : > { %s1506_s20 = sshll.u32 %s354_s19, 6  ;;  %1552 = vmatprep.subr.bf16.mxu1 (!%p1467_p4), %v1681_v0  ;;  %v1683_v2 = vld [vmem:[%s2143_s1] sm:$0xff] (!%p1467_p4)   ;;  %v1684_v4 = vld [vmem:[%s2143_s1 + $0x8] sm:$0xff] (!%p1467_p4)   ;;  %v1686_v5 = vld [vmem:[%s2142_s0 + $0x18] sm:$0xff] (!%p1467_p4)   ;;  %vm684_vm2 = vcmask (!%p1467_p4), 15360   ;;  %vm693_vm3 = vcmask (!%p1467_p4), 9216  }
  0x10   : > { %s1814_s23 = scalar_lea.vmem %s2147_s5, %s1506_s20  ;;  %1553 = vmatpush3.bf16.msra.mxu1 (!%p1467_p4), %v1681_v0  ;;  %1556 = vmatprep.mubr.msk.bf16.mxu1 (!%p1467_p4), %vm393_vm0, %v1683_v2  ;;  %v1687_v6 = vld [vmem:[%s2144_s2] sm:$0xff] (!%p1467_p4)   ;;  %v1736_v19 = vmov (!%p1467_p4), 0.0   ;;  %v1737_v20 = vmov (!%p1467_p4), 0  }
  0x11   : > { %1554 = vmatprep.subr.bf16.mxu1 (!%p1467_p4), %v1682_v1  ;;  %1568 = vmatprep.subr.bf16.mxu0 (!%p1467_p4), %v1687_v6  ;;  %676 = vst [vmem:[#allocation3] sm:$0xff] (!%p1467_p4), %v1736_v19  ;;  %677 = vst [vmem:[#allocation3 + $0x8] sm:$0xff] (!%p1467_p4), %v1736_v19  ;;  %v1478_v21 = vld [vmem:[%s2145_s3] ss:$0 sm:$0xff] (!%p1467_p4) }
  0x12   : > { %1569 = vmatpush3.bf16.msra.mxu0 (!%p1467_p4), %v1687_v6  ;;  %678 = vst [vmem:[#allocation3 + $0x10] sm:$0xff] (!%p1467_p4), %v1736_v19  ;;  %679 = vst [vmem:[#allocation3 + $0x18] sm:$0xff] (!%p1467_p4), %v1736_v19  ;;  %v1484_v23 = vld [vmem:[%s2146_s4] ss:$0 sm:$0xff] (!%p1467_p4) }
  0x13   : > { %680 = vst [vmem:[#allocation3 + $0x20] sm:$0xff] (!%p1467_p4), %v1736_v19  ;;  %681 = vst [vmem:[#allocation3 + $0x28] sm:$0xff] (!%p1467_p4), %v1736_v19 }
  0x14   : > { %1555 = vmatpush3.bf16.msra.mxu1 (!%p1467_p4), %v1682_v1  ;;  %682 = vst [vmem:[#allocation3 + $0x30] sm:$0xff] (!%p1467_p4), %v1736_v19  ;;  %683 = vst [vmem:[#allocation3 + $0x38] sm:$0xff] (!%p1467_p4), %v1736_v19 }
  0x15   : > { %1560 = vmatprep.subr.bf16.mxu1 %v1685_v3  ;;  %685 = vst.msk [vmem:[#allocation4] sm:$0xff] %vm684_vm2, %v1737_v20  ;;  %686 = vst.msk [vmem:[#allocation4 + $0x8] sm:$0xff] %vm684_vm2, %v1737_v20 }
  0x16   : > { %687 = vst.msk [vmem:[#allocation4 + $0x10] sm:$0xff] %vm684_vm2, %v1737_v20  ;;  %688 = vst.msk [vmem:[#allocation4 + $0x18] sm:$0xff] %vm684_vm2, %v1737_v20 }
  0x17   : > { %1557 = vmatmul.mubr.msk.bf16.vlgmr.msra.gmra.mrb[0].mxu1 %vm393_vm0, %v1684_v4  ;;  %689 = vst.msk [vmem:[#allocation4 + $0x20] sm:$0xff] %vm684_vm2, %v1737_v20  ;;  %690 = vst.msk [vmem:[#allocation4 + $0x28] sm:$0xff] %vm684_vm2, %v1737_v20 }
  0x18   : > { %1561 = vmatpush3.bf16.msra.mxu1 %v1685_v3  ;;  %1564 = vmatprep.mubr.msk.bf16.mxu1 %vm393_vm0, %v1683_v2  ;;  %691 = vst.msk [vmem:[#allocation4 + $0x30] sm:$0xff] %vm684_vm2, %v1737_v20  ;;  %692 = vst.msk [vmem:[#allocation4 + $0x38] sm:$0xff] %vm684_vm2, %v1737_v20 }
  0x19   : > { %1562 = vmatprep.subr.bf16.mxu1 %v1686_v5  ;;  %694 = vst.msk [vmem:[#allocation5] sm:$0x3] %vm693_vm3, %v1736_v19 }
  0x1c   : > { %1563 = vmatpush3.bf16.msra.mxu1 %v1686_v5 }
  0x1f   : > { %1565 = vmatmul.mubr.msk.bf16.vlgmr.msra.gmra.mrb[4].mxu1 %vm393_vm0, %v1684_v4 }
  0xea   : > { %v1558_v7 = vpop.f32.mrb[0].mxu1 }
  0xeb   : > { %v434_v8 = vpop.f32.mrb[1].mxu1 }
  0xec   : > { %v1559_v9 = vpop.f32.mrb[2].mxu1 }
  0xed   : > { %v515_v10 = vpack.c.bf16 %v1559_v9, %v1558_v7  ;;  %v437_v11 = vpop.f32.mrb[3].mxu1 }
  0xee   : > { %v514_v12 = vpack.c.bf16 %v437_v11, %v434_v8 }
  0xf0   : > { %1570 = vmatprep.mubr.msk.bf16.mxu0 %vm533_vm1, %v514_v12 }
  0xf1   : > { %1571 = vmatmul.mubr.msk.bf16.vlgmr.msra.gmra.mrb[0].mxu0 %vm533_vm1, %v515_v10 }
  0xf2   : > { %v1566_v13 = vpop.f32.mrb[4].mxu1 }
  0xf3   : > { %v499_v14 = vpop.f32.mrb[5].mxu1 }
  0xf4   : > { %v1567_v15 = vpop.f32.mrb[6].mxu1 }
  0xf5   : > { %v517_v16 = vpack.c.bf16 %v1567_v15, %v1566_v13  ;;  %v502_v17 = vpop.f32.mrb[7].mxu1 }
  0xf6   : > { %v516_v18 = vpack.c.bf16 %v502_v17, %v499_v14 }
  0xf8   : > { %1574 = vmatprep.mubr.msk.bf16.mxu0 %vm533_vm1, %v516_v18 }
  0xf9   : > { %1575 = vmatmul.mubr.msk.bf16.gmra.mrb[4].mxu0 %vm533_vm1, %v517_v16 }
 0x1c4   : > { %v1572_v22 = vpop.f32.mrb[0].mxu0 }
 0x1c5   : > { %v589_v24 = vadd.f32 %v1572_v22, %v1478_v21  ;;  %v580_v25 = vpop.f32.mrb[1].mxu0 }
 0x1c6   : > { %v581_v26 = vadd.f32 %v1478_v21, %v580_v25  ;;  %v1573_v27 = vpop.f32.mrb[2].mxu0 }
 0x1c7   : > { %vm613_vm4 = vcmp.gt.f32.partialorder %v589_v24, 0.0  ;;  %v628_v28 = vmul.f32 %v1484_v23, %v589_v24  ;;  %v592_v29 = vadd.f32 %v1573_v27, %v1478_v21  ;;  %v583_v30 = vpop.f32.mrb[3].mxu0 }
 0x1c8   : > { %vm611_vm5 = vcmp.gt.f32.partialorder %v581_v26, 0.0  ;;  %v626_v31 = vmul.f32 %v1484_v23, %v581_v26  ;;  %v584_v32 = vadd.f32 %v1478_v21, %v583_v30 }
 0x1c9   : > { %v636_v33 = vsel %vm613_vm4, %v589_v24, %v628_v28  ;;  %vm614_vm6 = vcmp.gt.f32.partialorder %v592_v29, 0.0  ;;  %v629_v34 = vmul.f32 %v1484_v23, %v592_v29 }
 0x1ca   : > { %644 = vst [vmem:[%s2148_s6 + $0x10] sm:$0xff] %v636_v33  ;;  %670 = vst [vmem:[#allocation2 + $0x10] sm:$0xff] %v636_v33  ;;  %v634_v35 = vsel %vm611_vm5, %v581_v26, %v626_v31  ;;  %vm612_vm7 = vcmp.gt.f32.partialorder %v584_v32, 0.0  ;;  %v627_v36 = vmul.f32 %v1484_v23, %v584_v32 }
 0x1cb   : > { %642 = vst [vmem:[%s2148_s6] sm:$0xff] %v634_v35  ;;  %668 = vst [vmem:[#allocation2] sm:$0xff] %v634_v35  ;;  %v637_v37 = vsel %vm614_vm6, %v592_v29, %v629_v34 }
 0x1cc   : > { %645 = vst [vmem:[%s2148_s6 + $0x18] sm:$0xff] %v637_v37  ;;  %671 = vst [vmem:[#allocation2 + $0x18] sm:$0xff] %v637_v37  ;;  %v635_v38 = vsel %vm612_vm7, %v584_v32, %v627_v36  ;;  %v1576_v39 = vpop.f32.mrb[4].mxu0 }
 0x1cd   : > { %643 = vst [vmem:[%s2148_s6 + $0x8] sm:$0xff] %v635_v38  ;;  %v650_v40 = vadd.f32 %v635_v38, %v634_v35  ;;  %669 = vst [vmem:[#allocation2 + $0x8] sm:$0xff] %v635_v38  ;;  %v605_v41 = vadd.f32 %v1576_v39, %v1478_v21  ;;  %v596_v42 = vpop.f32.mrb[5].mxu0 }
 0x1ce   : > { %v597_v43 = vadd.f32 %v1478_v21, %v596_v42  ;;  %v1577_v44 = vpop.f32.mrb[6].mxu0 }
 0x1cf   : > { %v651_v45 = vadd.f32 %v650_v40, %v636_v33  ;;  %vm617_vm8 = vcmp.gt.f32.partialorder %v605_v41, 0.0  ;;  %v632_v46 = vmul.f32 %v1484_v23, %v605_v41  ;;  %v608_v47 = vadd.f32 %v1577_v44, %v1478_v21  ;;  %v599_v48 = vpop.f32.mrb[7].mxu0 }
 0x1d0   : > { %vm615_vm9 = vcmp.gt.f32.partialorder %v597_v43, 0.0  ;;  %v630_v49 = vmul.f32 %v1484_v23, %v597_v43  ;;  %v600_v50 = vadd.f32 %v1478_v21, %v599_v48 }
 0x1d1   : > { %v652_v51 = vadd.f32 %v651_v45, %v637_v37  ;;  %v640_v52 = vsel %vm617_vm8, %v605_v41, %v632_v46  ;;  %vm618_vm10 = vcmp.gt.f32.partialorder %v608_v47, 0.0  ;;  %v633_v53 = vmul.f32 %v1484_v23, %v608_v47 }
 0x1d2   : > { %648 = vst [vmem:[%s2148_s6 + $0x30] sm:$0xff] %v640_v52  ;;  %674 = vst [vmem:[#allocation2 + $0x30] sm:$0xff] %v640_v52  ;;  %v638_v54 = vsel %vm615_vm9, %v597_v43, %v630_v49  ;;  %vm616_vm11 = vcmp.gt.f32.partialorder %v600_v50, 0.0  ;;  %v631_v55 = vmul.f32 %v1484_v23, %v600_v50 }
 0x1d3   : > { %v653_v56 = vrot.slane %v652_v51, 4  ;;  %646 = vst [vmem:[%s2148_s6 + $0x20] sm:$0xff] %v638_v54  ;;  %672 = vst [vmem:[#allocation2 + $0x20] sm:$0xff] %v638_v54  ;;  %v641_v57 = vsel %vm618_vm10, %v608_v47, %v633_v53 }
 0x1d4   : > { %649 = vst [vmem:[%s2148_s6 + $0x38] sm:$0xff] %v641_v57  ;;  %675 = vst [vmem:[#allocation2 + $0x38] sm:$0xff] %v641_v57  ;;  %v639_v58 = vsel %vm616_vm11, %v600_v50, %v631_v55 }
 0x1d5   : > { %v654_v59 = vadd.f32 %v653_v56, %v652_v51  ;;  %647 = vst [vmem:[%s2148_s6 + $0x28] sm:$0xff] %v639_v58  ;;  %673 = vst [vmem:[#allocation2 + $0x28] sm:$0xff] %v639_v58 }
 0x1d7   : > { %v655_v60 = vrot.slane %v654_v59, 2 }
 0x1d9   : > { %v656_v61 = vadd.f32 %v655_v60, %v654_v59 }
 0x1db   : > { %v657_v62 = vrot.slane %v656_v61, 1 }
 0x1dd   : > { %v658_v63 = vadd.f32 %v657_v62, %v656_v61 }
 0x1df   : > { %v1485_v0 = vmul.f32 -0.03125, %v658_v63 }
 0x1e1   : > { %v662_v1 = vmul.f32 1.442695, %v1485_v0 }
 0x1e3   : > { %1688 = vpow2.f32 %v662_v1 }
 0x1ed   : > { %v1689_v2 = vpop.eup %1688 }
 0x1ee   : > { %v664_v3 = vadd.f32 1.0, %v1689_v2 }
 0x1f0   : > { %1690 = vrcp.f32 %v664_v3 }
 0x1fa   : > { %v1691_v4 = vpop.eup %1690 }
 0x1fb   : > { %667 = vst [vmem:[%s2149_s7] sm:$0x1] %v1691_v4 }
 0x1fc PF: > { %v1885_v5 = vld [vmem:[%s1814_s23] sm:$0xff]  ;;  %v1888_v6 = vld [vmem:[%s1814_s23 + $0x10] sm:$0xff]  ;;  %v1891_v7 = vld [vmem:[%s1814_s23 + $0x8] sm:$0xff]  ;;  %vm912_vm12 = vcmask 523264   ;;  %p1502_p5 = scmp.ne.s32.totalorder %s1805_s18, 1 }
 0x1fd   : > { %v759_v8 = vmul.f32 %v1885_v5, %v1885_v5  ;;  %v761_v9 = vmul.f32 %v1888_v6, %v1888_v6  ;;  %v1898_v10 = vld [vmem:[%s1814_s23 + $0x18] sm:$0xff]  ;;  %v760_v11 = vmul.f32 %v1891_v7, %v1891_v7  ;;  %v1905_v13 = vld [vmem:[%s1814_s23 + $0x28] sm:$0xff]  ;;  %v1908_v14 = vld [vmem:[%s1814_s23 + $0x20] sm:$0xff] }
 0x1fe   : > { %v762_v12 = vmul.f32 %v1898_v10, %v1898_v10  ;;  %v764_v15 = vmul.f32 %v1905_v13, %v1905_v13  ;;  %v763_v16 = vmul.f32 %v1908_v14, %v1908_v14  ;;  %v1915_v17 = vld [vmem:[%s1814_s23 + $0x38] sm:$0xff]  ;;  %v1918_v18 = vld [vmem:[%s1814_s23 + $0x30] sm:$0xff]  ;;  %v1924_v21 = vld [vmem:[#allocation2] sm:$0xff] }
 0x1ff   : > { %767 = vadd.xlane.f32.xlu0 %v759_v8  ;;  %771 = vadd.xlane.f32.xlu1 %v761_v9  ;;  %v766_v19 = vmul.f32 %v1915_v17, %v1915_v17  ;;  %v765_v20 = vmul.f32 %v1918_v18, %v1918_v18  ;;  %v1926_v22 = vld [vmem:[#allocation2 + $0x8] sm:$0xff]  ;;  %v711_v23 = vmul.f32 %v1924_v21, %v1924_v21  ;;  %v1932_v25 = vld [vmem:[#allocation2 + $0x10] sm:$0xff]  ;;  %v1934_v26 = vld [vmem:[#allocation2 + $0x18] sm:$0xff] }
 0x200   : > { %v712_v24 = vmul.f32 %v1926_v22, %v1926_v22  ;;  %v713_v27 = vmul.f32 %v1932_v25, %v1932_v25  ;;  %v714_v28 = vmul.f32 %v1934_v26, %v1934_v26  ;;  %v1940_v29 = vld [vmem:[#allocation2 + $0x20] sm:$0xff]  ;;  %v1942_v30 = vld [vmem:[#allocation2 + $0x28] sm:$0xff]  ;;  %v1948_v33 = vld [vmem:[#allocation2 + $0x30] sm:$0xff] }
 0x201   : > { %v715_v31 = vmul.f32 %v1940_v29, %v1940_v29  ;;  %v716_v32 = vmul.f32 %v1942_v30, %v1942_v30  ;;  %v1950_v34 = vld [vmem:[#allocation2 + $0x38] sm:$0xff]  ;;  %v717_v35 = vmul.f32 %v1948_v33, %v1948_v33 }
 0x202   : > { %v718_v36 = vmul.f32 %v1950_v34, %v1950_v34 }
 0x203   : > { %769 = vadd.xlane.f32.xlu0 %v760_v11  ;;  %773 = vadd.xlane.f32.xlu1 %v762_v12 }
 0x207   : > { %777 = vadd.xlane.f32.xlu1 %v764_v15  ;;  %775 = vadd.xlane.f32.xlu0 %v763_v16 }
 0x20b   : > { %781 = vadd.xlane.f32.xlu1 %v766_v19  ;;  %779 = vadd.xlane.f32.xlu0 %v765_v20 }
 0x20f   : > { %719 = vadd.xlane.f32.xlu0 %v711_v23  ;;  %721 = vadd.xlane.f32.xlu1 %v712_v24 }
 0x213   : > { %723 = vadd.xlane.f32.xlu0 %v713_v27  ;;  %725 = vadd.xlane.f32.xlu1 %v714_v28 }
 0x217   : > { %727 = vadd.xlane.f32.xlu0 %v715_v31  ;;  %729 = vadd.xlane.f32.xlu1 %v716_v32 }
 0x21b   : > { %731 = vadd.xlane.f32.xlu0 %v717_v35  ;;  %733 = vadd.xlane.f32.xlu1 %v718_v36 }
 0x28c   : > { %v768_v37 = vpop.xlane.xlu0 %767  ;;  %v772_v38 = vpop.xlane.xlu1 %771 }
 0x28d   : > { %v783_v39 = vadd.f32 1e-12, %v768_v37  ;;  %v785_v40 = vadd.f32 1e-12, %v772_v38 }
 0x28f   : > { %1692 = vrsqrt.f32 %v785_v40 }
 0x290   : > { %v770_v41 = vpop.xlane.xlu0 %769  ;;  %v774_v42 = vpop.xlane.xlu1 %773  ;;  %1694 = vrsqrt.f32 %v783_v39 }
 0x291   : > { %v784_v43 = vadd.f32 1e-12, %v770_v41  ;;  %v786_v44 = vadd.f32 1e-12, %v774_v42 }
 0x293   : > { %1696 = vrsqrt.f32 %v784_v43 }
 0x294   : > { %1698 = vrsqrt.f32 %v786_v44  ;;  %v778_v45 = vpop.xlane.xlu1 %777  ;;  %v776_v46 = vpop.xlane.xlu0 %775 }
 0x295   : > { %v788_v47 = vadd.f32 1e-12, %v778_v45  ;;  %v787_v48 = vadd.f32 1e-12, %v776_v46 }
 0x297   : > { %1700 = vrsqrt.f32 %v788_v47 }
 0x298   : > { %1702 = vrsqrt.f32 %v787_v48  ;;  %v782_v49 = vpop.xlane.xlu1 %781  ;;  %v780_v50 = vpop.xlane.xlu0 %779 }
 0x299   : > { %v790_v51 = vadd.f32 1e-12, %v782_v49  ;;  %v789_v52 = vadd.f32 1e-12, %v780_v50  ;;  %v1693_v53 = vpop.eup %1692 }
 0x29a   : > { %v1695_v54 = vpop.eup %1694  ;;  %v801_v57 = vmul.f32 %v1693_v53, %v1888_v6 }
 0x29b   : > { %1704 = vrsqrt.f32 %v790_v51  ;;  %v799_v60 = vmul.f32 %v1695_v54, %v1885_v5 }
 0x29c   : > { %1706 = vrsqrt.f32 %v789_v52  ;;  %v720_v55 = vpop.xlane.xlu0 %719  ;;  %v722_v5 = vpop.xlane.xlu1 %721 }
 0x29d   : > { %v1697_v56 = vpop.eup %1696  ;;  %v735_v58 = vadd.f32 1e-12, %v720_v55 }
 0x29e   : > { %v1699_v59 = vpop.eup %1698  ;;  %v800_v61 = vmul.f32 %v1697_v56, %v1891_v7 }
 0x29f   : > { %v802_v62 = vmul.f32 %v1699_v59, %v1898_v10  ;;  %1708 = vrsqrt.f32 %v735_v58 }
 0x2a0   : > { %v1634_v63 = vpack.c.bf16 %v800_v61, %v799_v60  ;;  %v724_v10 = vpop.xlane.xlu0 %723 }
 0x2a1   : > { %v1701_v0 = vpop.eup %1700  ;;  %v1638_v1 = vpack.c.bf16 %v802_v62, %v801_v57  ;;  %v737_v20 = vadd.f32 1e-12, %v724_v10 }
 0x2a2   : > { %v1703_v2 = vpop.eup %1702  ;;  %1635 = vmatprep.subr.bf16.mxu0 %v1634_v63  ;;  %1651 = vmatprep.subr.bf16.mxu1 %v1634_v63  ;;  %v804_v3 = vmul.f32 %v1701_v0, %v1905_v13  ;;  %v726_v13 = vpop.xlane.xlu1 %725 }
 0x2a3   : > { %1637 = vmatpush3.bf16.xpose.msra.mxu0 %v1634_v63  ;;  %1653 = vmatpush3.bf16.msra.mxu1 %v1634_v63  ;;  %v803_v4 = vmul.f32 %v1703_v2, %v1908_v14  ;;  %v736_v14 = vadd.f32 1e-12, %v722_v5  ;;  %v738_v23 = vadd.f32 1e-12, %v726_v13 }
 0x2a4   : > { %1639 = vmatprep.subr.bf16.mxu0 %v1638_v1  ;;  %1655 = vmatprep.subr.bf16.mxu1 %v1638_v1  ;;  %v728_v19 = vpop.xlane.xlu0 %727 }
 0x2a5   : > { %v1705_v6 = vpop.eup %1704  ;;  %v1642_v7 = vpack.c.bf16 %v804_v3, %v803_v4  ;;  %1710 = vrsqrt.f32 %v736_v14 }
 0x2a6   : > { %v1707_v8 = vpop.eup %1706  ;;  %v806_v9 = vmul.f32 %v1705_v6, %v1915_v17  ;;  %v730_v17 = vpop.xlane.xlu1 %729  ;;  %1712 = vrsqrt.f32 %v737_v20 }
 0x2a7   : > { %1657 = vmatpush3.bf16.msra.mxu1 %v1638_v1  ;;  %v805_v11 = vmul.f32 %v1707_v8, %v1918_v18  ;;  %v739_v18 = vadd.f32 1e-12, %v728_v19  ;;  %1714 = vrsqrt.f32 %v738_v23  ;;  %v740_v27 = vadd.f32 1e-12, %v730_v17 }
 0x2a8   : > { %1659 = vmatprep.subr.bf16.mxu1 %v1642_v7  ;;  %v732_v24 = vpop.xlane.xlu0 %731 }
 0x2a9   : > { %v1709_v12 = vpop.eup %1708  ;;  %v1646_v15 = vpack.c.bf16 %v806_v9, %v805_v11  ;;  %1716 = vrsqrt.f32 %v739_v18  ;;  %v741_v28 = vadd.f32 1e-12, %v732_v24 }
 0x2aa   : > { %v751_v16 = vmul.f32 %v1709_v12, %v1924_v21  ;;  %v734_v31 = vpop.xlane.xlu1 %733  ;;  %1718 = vrsqrt.f32 %v740_v27 }
 0x2ab   : > { %1641 = vmatpush3.bf16.xpose.msra.mxu0 %v1638_v1  ;;  %1661 = vmatpush3.bf16.msra.mxu1 %v1642_v7  ;;  %v742_v32 = vadd.f32 1e-12, %v734_v31  ;;  %1720 = vrsqrt.f32 %v741_v28  ;;  %v937_v1 = vlaneseq }
 0x2ac   : > { %1643 = vmatprep.subr.bf16.mxu0 %v1642_v7  ;;  %1663 = vmatprep.subr.bf16.mxu1 %v1646_v15 }
 0x2ad   : > { %1594 = vmatprep.mubr.f32.mxu0 %v751_v16  ;;  %1722 = vrsqrt.f32 %v742_v32  ;;  %v1981_v2 = vand.u32 127, %v937_v1 }
 0x2af   : > { %1665 = vmatpush3.bf16.msra.mxu1 %v1646_v15  ;;  %v1711_v35 = vpop.eup %1710 }
 0x2b0   : > { %v1713_v36 = vpop.eup %1712  ;;  %v752_v37 = vmul.f32 %v1711_v35, %v1926_v22 }
 0x2b1   : > { %v1715_v38 = vpop.eup %1714  ;;  %v753_v39 = vmul.f32 %v1713_v36, %v1932_v25 }
 0x2b2   : > { %v754_v41 = vmul.f32 %v1715_v38, %v1934_v26 }
 0x2b3   : > { %1645 = vmatpush3.bf16.xpose.msra.mxu0 %v1642_v7  ;;  %v1717_v40 = vpop.eup %1716 }
 0x2b4   : > { %1647 = vmatprep.subr.bf16.mxu0 %v1646_v15  ;;  %v1719_v42 = vpop.eup %1718  ;;  %v755_v43 = vmul.f32 %v1717_v40, %v1940_v29 }
 0x2b5   : > { %v1721_v44 = vpop.eup %1720  ;;  %v756_v45 = vmul.f32 %v1719_v42, %v1942_v30 }
 0x2b6   : > { %v757_v47 = vmul.f32 %v1721_v44, %v1948_v33 }
 0x2b7   : > { %v1723_v46 = vpop.eup %1722 }
 0x2b8   : > { %v758_v48 = vmul.f32 %v1723_v46, %v1950_v34 }
 0x2bb   : > { %1649 = vmatpush3.bf16.xpose.msra.mxu0 %v1646_v15 }
 0x2c2   : > { %1595 = vmatmul.mubr.f32.vlgmr.msra.gmra.mrb[0].mxu0 %v752_v37 }
 0x2c3   : > { %1597 = vmatprep.mubr.f32.mxu0 %v753_v39 }
 0x2c6   : > { %1598 = vmatmul.mubr.f32.gmra.mrb[2].mxu0 %v754_v41 }
 0x2c7   : > { %1600 = vmatprep.mubr.f32.mxu0 %v755_v43 }
 0x2ca   : > { %1601 = vmatmul.mubr.f32.gmra.mrb[4].mxu0 %v756_v45 }
 0x2cb   : > { %1603 = vmatprep.mubr.f32.mxu0 %v757_v47 }
 0x2ce   : > { %1604 = vmatmul.mubr.f32.gmra.mrb[6].mxu0 %v758_v48 }
 0x395   : > { %v1596_v49 = vpop.f32.mrb[0].mxu0 }
 0x396   : > { %v873_v50 = vpop.f32.mrb[1].mxu0  ;;  %v916_v51 = vsel %vm912_vm12, %v1596_v49, -inf }
 0x397   : > { %917 = vmax.xlane.f32.xlu1 %v916_v51  ;;  %v913_v52 = vsel %vm912_vm12, %v873_v50, -inf }
 0x398   : > { %914 = vmax.xlane.f32.xlu0 %v913_v52 }
 0x399   : > { %v1599_v53 = vpop.f32.mrb[2].mxu0 }
 0x39a   : > { %v883_v54 = vpop.f32.mrb[3].mxu0  ;;  %v922_v55 = vsel %vm912_vm12, %v1599_v53, -inf }
 0x39b   : > { %923 = vmax.xlane.f32.xlu1 %v922_v55  ;;  %v919_v56 = vsel %vm912_vm12, %v883_v54, -inf }
 0x39c   : > { %920 = vmax.xlane.f32.xlu0 %v919_v56 }
 0x39d   : > { %v1602_v57 = vpop.f32.mrb[4].mxu0 }
 0x39e   : > { %v893_v58 = vpop.f32.mrb[5].mxu0  ;;  %v928_v59 = vsel %vm912_vm12, %v1602_v57, -inf }
 0x39f   : > { %929 = vmax.xlane.f32.xlu1 %v928_v59  ;;  %v925_v60 = vsel %vm912_vm12, %v893_v58, -inf }
 0x3a0   : > { %926 = vmax.xlane.f32.xlu0 %v925_v60 }
 0x3a1   : > { %v1605_v61 = vpop.f32.mrb[6].mxu0 }
 0x3a2   : > { %v903_v62 = vpop.f32.mrb[7].mxu0  ;;  %v934_v63 = vsel %vm912_vm12, %v1605_v61, -inf }
 0x3a3   : > { %935 = vmax.xlane.f32.xlu1 %v934_v63  ;;  %v931_v0 = vsel %vm912_vm12, %v903_v62, -inf }
 0x3a4   : > { %932 = vmax.xlane.f32.xlu0 %v931_v0 }
 0x424   : > { %v918_v3 = vpop.xlane.xlu1 %917 }
 0x425   : > { %vm940_vm13 = vcmp.ge.f32.partialorder %v1596_v49, %v918_v3  ;;  %v915_v4 = vpop.xlane.xlu0 %914 }
 0x426   : > { %v948_v5 = vsel %vm940_vm13, %v1981_v2, 64  ;;  %vm939_vm14 = vcmp.ge.f32.partialorder %v873_v50, %v915_v4 }
 0x427   : > { %v970_v6 = vsel %vm912_vm12, %v948_v5, 2147483647  ;;  %v947_v7 = vsel %vm939_vm14, %v1981_v2, 64 }
 0x428   : > { %v955_v8 = vsel %vm912_vm12, %v947_v7, 2147483647  ;;  %v924_v9 = vpop.xlane.xlu1 %923  ;;  %v972_v10 = vshra.s32 %v970_v6, 16  ;;  %v971_v51 = vand.u32 65535, %v970_v6 }
 0x429   : > { %vm942_vm15 = vcmp.ge.f32.partialorder %v1599_v53, %v924_v9  ;;  %v921_v11 = vpop.xlane.xlu0 %920  ;;  %v957_v12 = vshra.s32 %v955_v8, 16  ;;  %v956_v52 = vand.u32 65535, %v955_v8 }
 0x42a   : > { %v950_v15 = vsel %vm942_vm15, %v1981_v2, 64  ;;  %vm941_vm0 = vcmp.ge.f32.partialorder %v883_v54, %v921_v11  ;;  %v974_v13 = vcvt.s32.f32 %v972_v10  ;;  %v973_v54 = vcvt.s32.f32 %v971_v51 }
 0x42b   : > { %v1000_v16 = vsel %vm912_vm12, %v950_v15, 2147483647  ;;  %v949_v14 = vsel %vm941_vm0, %v1981_v2, 64  ;;  %v959_v19 = vcvt.s32.f32 %v957_v12  ;;  %vm1328_vm15 = vcmask 15360  }
 0x42c   : > { %v985_v20 = vsel %vm912_vm12, %v949_v14, 2147483647  ;;  %v930_v17 = vpop.xlane.xlu1 %929  ;;  %975 = vmin.xlane.f32.xlu1 %v974_v13  ;;  %v1002_v23 = vshra.s32 %v1000_v16, 16  ;;  %v1001_v55 = vand.u32 65535, %v1000_v16 }
 0x42d   : > { %vm944_vm1 = vcmp.ge.f32.partialorder %v1602_v57, %v930_v17  ;;  %960 = vmin.xlane.f32.xlu0 %v959_v19  ;;  %v927_v18 = vpop.xlane.xlu0 %926  ;;  %v987_v24 = vshra.s32 %v985_v20, 16  ;;  %v958_v57 = vcvt.s32.f32 %v956_v52 }
 0x42e   : > { %v952_v27 = vsel %vm944_vm1, %v1981_v2, 64  ;;  %vm943_vm2 = vcmp.ge.f32.partialorder %v893_v58, %v927_v18  ;;  %v1004_v28 = vcvt.s32.f32 %v1002_v23  ;;  %v986_v58 = vand.u32 65535, %v985_v20 }
 0x42f   : > { %v1030_v31 = vsel %vm912_vm12, %v952_v27, 2147483647  ;;  %v951_v32 = vsel %vm943_vm2, %v1981_v2, 64  ;;  %v989_v35 = vcvt.s32.f32 %v987_v24  ;;  %v1310_v27 = vstv %s1805_s18 }
 0x430   : > { %v1015_v36 = vsel %vm912_vm12, %v951_v32, 2147483647  ;;  %1005 = vmin.xlane.f32.xlu1 %v1004_v28  ;;  %v936_v37 = vpop.xlane.xlu1 %935  ;;  %v1032_v38 = vshra.s32 %v1030_v31, 16  ;;  %v1031_v63 = vand.u32 65535, %v1030_v31  ;;  %v988_v3 = vcvt.s32.f32 %v986_v58 }
 0x431   : > { %vm946_vm3 = vcmp.ge.f32.partialorder %v1605_v61, %v936_v37  ;;  %990 = vmin.xlane.f32.xlu0 %v989_v35  ;;  %v933_v39 = vpop.xlane.xlu0 %932  ;;  %v1017_v40 = vshra.s32 %v1015_v36, 16  ;;  %v1016_v4 = vand.u32 65535, %v1015_v36  ;;  %vm2007_vm14 = vcmp.eq.s32.totalorder %v1981_v2, %v1310_v27  ;;  %v1319_v27 = vld [vmem:[#allocation4 + $0x38] sm:$0xff] }
 0x432   : > { %v954_v41 = vsel %vm946_vm3, %v1981_v2, 64  ;;  %vm945_vm4 = vcmp.ge.f32.partialorder %v903_v62, %v933_v39  ;;  %v1034_v42 = vcvt.s32.f32 %v1032_v38  ;;  %v1003_v62 = vcvt.s32.f32 %v1001_v55 }
 0x433   : > { %v1060_v43 = vsel %vm912_vm12, %v954_v41, 2147483647  ;;  %v953_v44 = vsel %vm945_vm4, %v1981_v2, 64  ;;  %v1019_v45 = vcvt.s32.f32 %v1017_v40  ;;  %v1033_v8 = vcvt.s32.f32 %v1031_v63  ;;  %v1313_v40 = vld [vmem:[#allocation4 + $0x8] sm:$0xff] }
 0x434   : > { %v1045_v46 = vsel %vm912_vm12, %v953_v44, 2147483647  ;;  %1035 = vmin.xlane.f32.xlu1 %v1034_v42  ;;  %v1062_v47 = vshra.s32 %v1060_v43, 16  ;;  %v1061_v9 = vand.u32 65535, %v1060_v43  ;;  %v1018_v11 = vcvt.s32.f32 %v1016_v4  ;;  %v1312_v43 = vld [vmem:[#allocation4] sm:$0xff] }
 0x435   : > { %1020 = vmin.xlane.f32.xlu0 %v1019_v45  ;;  %v1047_v48 = vshra.s32 %v1045_v46, 16  ;;  %v1046_v12 = vand.u32 65535, %v1045_v46  ;;  %v1738_v58 = vmov 0.0  }
 0x436   : > { %v1064_v49 = vcvt.s32.f32 %v1062_v47  ;;  %v1063_v14 = vcvt.s32.f32 %v1061_v9  ;;  %v1317_v9 = vld [vmem:[#allocation4 + $0x28] sm:$0xff] }
 0x437   : > { %v1049_v50 = vcvt.s32.f32 %v1047_v48  ;;  %v1048_v20 = vcvt.s32.f32 %v1046_v12  ;;  %v1316_v12 = vld [vmem:[#allocation4 + $0x20] sm:$0xff] }
 0x438   : > { %1065 = vmin.xlane.f32.xlu1 %v1064_v49 }
 0x439   : > { %1050 = vmin.xlane.f32.xlu0 %v1049_v50 }
 0x4b9   : > { %v976_v53 = vpop.xlane.xlu1 %975 }
 0x4ba   : > { %v961_v56 = vpop.xlane.xlu0 %960  ;;  %vm977_vm5 = vcmp.eq.f32.partialorder %v974_v13, %v976_v53  ;;  %v982_v18 = vcvt.f32.s32 %v976_v53 }
 0x4bb   : > { %v978_v59 = vsel %vm977_vm5, %v973_v54, inf  ;;  %vm962_vm6 = vcmp.eq.f32.partialorder %v959_v19, %v961_v56  ;;  %v967_v24 = vcvt.f32.s32 %v961_v56  ;;  %v1315_v54 = vld [vmem:[#allocation4 + $0x18] sm:$0xff] }
 0x4bc   : > { %979 = vmin.xlane.f32.xlu1 %v978_v59  ;;  %v963_v60 = vsel %vm962_vm6, %v958_v57, inf  ;;  %v983_v31 = vshll.u32 %v982_v18, 16  ;;  %v1314_v57 = vld [vmem:[#allocation4 + $0x10] sm:$0xff] }
 0x4bd   : > { %v1006_v61 = vpop.xlane.xlu1 %1005  ;;  %964 = vmin.xlane.f32.xlu0 %v963_v60  ;;  %v968_v37 = vshll.u32 %v967_v24, 16 }
 0x4be   : > { %v991_v0 = vpop.xlane.xlu0 %990  ;;  %vm1007_vm7 = vcmp.eq.f32.partialorder %v1004_v28, %v1006_v61  ;;  %v1012_v32 = vcvt.f32.s32 %v1006_v61 }
 0x4bf   : > { %v1008_v5 = vsel %vm1007_vm7, %v1003_v62, inf  ;;  %vm992_vm8 = vcmp.eq.f32.partialorder %v989_v35, %v991_v0  ;;  %v997_v38 = vcvt.f32.s32 %v991_v0 }
 0x4c0   : > { %1009 = vmin.xlane.f32.xlu1 %v1008_v5  ;;  %v993_v6 = vsel %vm992_vm8, %v988_v3, inf  ;;  %v1013_v48 = vshll.u32 %v1012_v32, 16  ;;  %v1318_v32 = vld [vmem:[#allocation4 + $0x30] sm:$0xff]  ;;  %vm1345_vm8 = vcmask 9216  }
 0x4c1   : > { %v1036_v7 = vpop.xlane.xlu1 %1035  ;;  %994 = vmin.xlane.f32.xlu0 %v993_v6  ;;  %v998_v52 = vshll.u32 %v997_v38, 16 }
 0x4c2   : > { %v1021_v10 = vpop.xlane.xlu0 %1020  ;;  %vm1037_vm9 = vcmp.eq.f32.partialorder %v1034_v42, %v1036_v7  ;;  %v1042_v44 = vcvt.f32.s32 %v1036_v7 }
 0x4c3   : > { %v1038_v15 = vsel %vm1037_vm9, %v1033_v8, inf  ;;  %vm1022_vm10 = vcmp.eq.f32.partialorder %v1019_v45, %v1021_v10  ;;  %v1027_v45 = vcvt.f32.s32 %v1021_v10 }
 0x4c4   : > { %1039 = vmin.xlane.f32.xlu1 %v1038_v15  ;;  %v1023_v13 = vsel %vm1022_vm10, %v1018_v11, inf  ;;  %v1043_v60 = vshll.u32 %v1042_v44, 16  ;;  %v1270_v44 = vld [vmem:[#allocation3] sm:$0xff] }
 0x4c5   : > { %v1999_v16 = vpop.xlane.xlu1 %1065  ;;  %1024 = vmin.xlane.f32.xlu0 %v1023_v13  ;;  %v1028_v61 = vshll.u32 %v1027_v45, 16 }
 0x4c6   : > { %v2001_v19 = vpop.xlane.xlu0 %1050  ;;  %vm1067_vm11 = vcmp.eq.f32.partialorder %v1064_v49, %v1999_v16  ;;  %v1072_v3 = vcvt.f32.s32 %v1999_v16 }
 0x4c7   : > { %v1068_v17 = vsel %vm1067_vm11, %v1063_v14, inf  ;;  %vm1052_vm13 = vcmp.eq.f32.partialorder %v1049_v50, %v2001_v19  ;;  %v1057_v7 = vcvt.f32.s32 %v2001_v19 }
 0x4c8   : > { %1069 = vmin.xlane.f32.xlu1 %v1068_v17  ;;  %v1053_v23 = vsel %vm1052_vm13, %v1048_v20, inf  ;;  %v1073_v19 = vshll.u32 %v1072_v3, 16 }
 0x4c9   : > { %1054 = vmin.xlane.f32.xlu0 %v1053_v23  ;;  %v1058_v18 = vshll.u32 %v1057_v7, 16 }
 0x549   : > { %v980_v28 = vpop.xlane.xlu1 %979 }
 0x54a   : > { %v981_v35 = vcvt.f32.s32 %v980_v28  ;;  %v965_v36 = vpop.xlane.xlu0 %964 }
 0x54b   : > { %v966_v41 = vcvt.f32.s32 %v965_v36 }
 0x54c   : > { %v984_v42 = vadd.s32 %v983_v31, %v981_v35 }
 0x54d   : > { %v969_v46 = vadd.s32 %v968_v37, %v966_v41  ;;  %v1010_v47 = vpop.xlane.xlu1 %1009 }
 0x54e   : > { %v1321_v49 = vsel %vm2007_vm14, %v984_v42, %v1313_v40  ;;  %v1011_v50 = vcvt.f32.s32 %v1010_v47  ;;  %v995_v51 = vpop.xlane.xlu0 %994  ;;  %vm1076_vm0 = vcmp.eq.s32.totalorder %v1981_v2, %v984_v42 }
 0x54f   : > { %1330 = vst.msk [vmem:[#allocation4 + $0x8] sm:$0xff] %vm1328_vm15, %v1321_v49  ;;  %v1320_v53 = vsel %vm2007_vm14, %v969_v46, %v1312_v43  ;;  %v996_v55 = vcvt.f32.s32 %v995_v51  ;;  %vm1075_vm1 = vcmp.eq.s32.totalorder %v1981_v2, %v969_v46  ;;  %v1487_v0 = vsel %vm1076_vm0, 1.0, %v1738_v58  ;;  %v1271_v43 = vld [vmem:[#allocation3 + $0x8] sm:$0xff] }
 0x550   : > { %1329 = vst.msk [vmem:[#allocation4] sm:$0xff] %vm1328_vm15, %v1320_v53  ;;  %v1014_v56 = vadd.s32 %v1013_v48, %v1011_v50  ;;  %v1486_v59 = vsel %vm1075_vm1, 1.0, %v1738_v58 }
 0x551   : > { %v999_v62 = vadd.s32 %v998_v52, %v996_v55  ;;  %v1040_v63 = vpop.xlane.xlu1 %1039  ;;  %1622 = vmatprep.mubr.msk.f32.mxu1 %vm912_vm12, %v1486_v59  ;;  %v1273_v52 = vld [vmem:[#allocation3 + $0x18] sm:$0xff] }
 0x552   : > { %v1323_v4 = vsel %vm2007_vm14, %v1014_v56, %v1315_v54  ;;  %v1041_v5 = vcvt.f32.s32 %v1040_v63  ;;  %1623 = vmatmul.mubr.msk.f32.vlgmr.msra.gmra.mrb[0].mxu1 %vm912_vm12, %v1487_v0  ;;  %v1025_v6 = vpop.xlane.xlu0 %1024  ;;  %vm1078_vm2 = vcmp.eq.s32.totalorder %v1981_v2, %v1014_v56  ;;  %v1272_v54 = vld [vmem:[#allocation3 + $0x10] sm:$0xff]  ;;  %v1274_v0 = vld [vmem:[#allocation3 + $0x20] sm:$0xff] }
 0x553   : > { %1332 = vst.msk [vmem:[#allocation4 + $0x18] sm:$0xff] %vm1328_vm15, %v1323_v4  ;;  %v1322_v8 = vsel %vm2007_vm14, %v999_v62, %v1314_v57  ;;  %v1026_v10 = vcvt.f32.s32 %v1025_v6  ;;  %vm1077_vm3 = vcmp.eq.s32.totalorder %v1981_v2, %v999_v62  ;;  %v1489_v14 = vsel %vm1078_vm2, 1.0, %v1738_v58  ;;  %v1275_v62 = vld [vmem:[#allocation3 + $0x28] sm:$0xff] }
 0x554   : > { %1331 = vst.msk [vmem:[#allocation4 + $0x10] sm:$0xff] %vm1328_vm15, %v1322_v8  ;;  %v1044_v11 = vadd.s32 %v1043_v60, %v1041_v5  ;;  %v1488_v15 = vsel %vm1077_vm3, 1.0, %v1738_v58 }
 0x555   : > { %v1029_v13 = vadd.s32 %v1028_v61, %v1026_v10  ;;  %v1070_v16 = vpop.xlane.xlu1 %1069  ;;  %1625 = vmatprep.mubr.msk.f32.mxu1 %vm912_vm12, %v1488_v15 }
 0x556   : > { %v1325_v20 = vsel %vm2007_vm14, %v1044_v11, %v1317_v9  ;;  %v1071_v17 = vcvt.f32.s32 %v1070_v16  ;;  %1626 = vmatmul.mubr.msk.f32.gmra.mrb[2].mxu1 %vm912_vm12, %v1489_v14  ;;  %v1055_v23 = vpop.xlane.xlu0 %1054  ;;  %vm1080_vm4 = vcmp.eq.s32.totalorder %v1981_v2, %v1044_v11  ;;  %v1277_v11 = vld [vmem:[#allocation3 + $0x38] sm:$0xff] }
 0x557   : > { %1334 = vst.msk [vmem:[#allocation4 + $0x28] sm:$0xff] %vm1328_vm15, %v1325_v20  ;;  %v1324_v24 = vsel %vm2007_vm14, %v1029_v13, %v1316_v12  ;;  %v1056_v28 = vcvt.f32.s32 %v1055_v23  ;;  %vm1079_vm5 = vcmp.eq.s32.totalorder %v1981_v2, %v1029_v13  ;;  %v1491_v37 = vsel %vm1080_vm4, 1.0, %v1738_v58  ;;  %v1276_v13 = vld [vmem:[#allocation3 + $0x30] sm:$0xff] }
 0x558   : > { %1333 = vst.msk [vmem:[#allocation4 + $0x20] sm:$0xff] %vm1328_vm15, %v1324_v24  ;;  %v1074_v31 = vadd.s32 %v1073_v19, %v1071_v17  ;;  %v1490_v35 = vsel %vm1079_vm5, 1.0, %v1738_v58 }
 0x559   : > { %v1059_v36 = vadd.s32 %v1058_v18, %v1056_v28  ;;  %1628 = vmatprep.mubr.msk.f32.mxu1 %vm912_vm12, %v1490_v35 }
 0x55a   : > { %v1327_v38 = vsel %vm2007_vm14, %v1074_v31, %v1319_v27  ;;  %1629 = vmatmul.mubr.msk.f32.gmra.mrb[4].mxu1 %vm912_vm12, %v1491_v37  ;;  %vm1082_vm6 = vcmp.eq.s32.totalorder %v1981_v2, %v1074_v31 }
 0x55b   : > { %1336 = vst.msk [vmem:[#allocation4 + $0x38] sm:$0xff] %vm1328_vm15, %v1327_v38  ;;  %v1326_v40 = vsel %vm2007_vm14, %v1059_v36, %v1318_v32  ;;  %vm1081_vm7 = vcmp.eq.s32.totalorder %v1981_v2, %v1059_v36  ;;  %v1493_v42 = vsel %vm1082_vm6, 1.0, %v1738_v58 }
 0x55c   : > { %1335 = vst.msk [vmem:[#allocation4 + $0x30] sm:$0xff] %vm1328_vm15, %v1326_v40  ;;  %v1492_v41 = vsel %vm1081_vm7, 1.0, %v1738_v58 }
 0x55d   : > { %1631 = vmatprep.mubr.msk.f32.mxu1 %vm912_vm12, %v1492_v41 }
 0x55e   : > { %1632 = vmatmul.mubr.msk.f32.gmra.mrb[6].mxu1 %vm912_vm12, %v1493_v42 }
 0x625   : > { %v1624_v45 = vpop.f32.mrb[0].mxu1 }
 0x626   : > { %v1229_v46 = vsub.f32 %v1624_v45, %v1926_v22  ;;  %v1279_v47 = vadd.f32 %v1624_v45, %v1271_v43  ;;  %v1295_v48 = vsub.f32 %v1926_v22, %v1624_v45  ;;  %v1189_v49 = vpop.f32.mrb[1].mxu1 }
 0x627   : > { %v1228_v50 = vsub.f32 %v1189_v49, %v1924_v21  ;;  %v1278_v2 = vadd.f32 %v1270_v44, %v1189_v49  ;;  %v1294_v51 = vsub.f32 %v1924_v21, %v1189_v49  ;;  %v1338_v49 = vshrl.u32 %v937_v1, 7 }
 0x628   : > { %v1237_v53 = vmul.f32 %v1229_v46, %v1229_v46  ;;  %1287 = vst [vmem:[#allocation3 + $0x8] sm:$0xff] %v1279_v47  ;;  %1303 = vst [vmem:[#allocation2 + $0x8] sm:$0xff] %v1295_v48 }
 0x629   : > { %v1236_v55 = vmul.f32 %v1228_v50, %v1228_v50  ;;  %1286 = vst [vmem:[#allocation3] sm:$0xff] %v1278_v2  ;;  %1302 = vst [vmem:[#allocation2] sm:$0xff] %v1294_v51  ;;  %v1627_v56 = vpop.f32.mrb[2].mxu1  ;;  %vm1339_vm12 = vcmp.eq.s32.totalorder %v1338_v49, 0  ;;  %v1343_v50 = vld [vmem:[#allocation5] sm:$0x3] }
 0x62a   : > { %v1231_v57 = vsub.f32 %v1627_v56, %v1934_v26  ;;  %v1281_v58 = vadd.f32 %v1627_v56, %v1273_v52  ;;  %v1297_v22 = vsub.f32 %v1934_v26, %v1627_v56  ;;  %v1199_v59 = vpop.f32.mrb[3].mxu1 }
 0x62b   : > { %v1230_v60 = vsub.f32 %v1199_v59, %v1932_v25  ;;  %v1280_v61 = vadd.f32 %v1272_v54, %v1199_v59  ;;  %v1296_v21 = vsub.f32 %v1932_v25, %v1199_v59  ;;  %v1244_v63 = vadd.f32 %v1237_v53, %v1236_v55 }
 0x62c   : > { %1289 = vst [vmem:[#allocation3 + $0x18] sm:$0xff] %v1281_v58  ;;  %1305 = vst [vmem:[#allocation2 + $0x18] sm:$0xff] %v1297_v22  ;;  %v1239_v8 = vmul.f32 %v1231_v57, %v1231_v57 }
 0x62d   : > { %v1238_v3 = vmul.f32 %v1230_v60, %v1230_v60  ;;  %1288 = vst [vmem:[#allocation3 + $0x10] sm:$0xff] %v1280_v61  ;;  %1304 = vst [vmem:[#allocation2 + $0x10] sm:$0xff] %v1296_v21  ;;  %v1630_v4 = vpop.f32.mrb[4].mxu1  ;;  %v1367_v60 = vld [vmem:[#allocation4] sm:$0xff] (!%p1502_p5)  ;;  %v1368_v21 = vld [vmem:[#allocation4 + $0x8] sm:$0xff] (!%p1502_p5) }
 0x62e   : > { %v1233_v5 = vsub.f32 %v1630_v4, %v1942_v30  ;;  %v1283_v6 = vadd.f32 %v1630_v4, %v1275_v62  ;;  %v1299_v26 = vsub.f32 %v1942_v30, %v1630_v4  ;;  %v1209_v7 = vpop.f32.mrb[5].mxu1  ;;  %1375 = vst.msk [vmem:[%s2151_s9] sm:$0xff] (!%p1502_p5), %vm1328_vm15, %v1367_v60  ;;  %v1369_v62 = vld [vmem:[#allocation4 + $0x10] sm:$0xff] (!%p1502_p5)  ;;  %1376 = vst.msk [vmem:[%s2151_s9 + $0x8] sm:$0xff] (!%p1502_p5), %vm1328_vm15, %v1368_v21 }
 0x62f   : > { %v1232_v9 = vsub.f32 %v1209_v7, %v1940_v29  ;;  %v1282_v10 = vadd.f32 %v1274_v0, %v1209_v7  ;;  %v1298_v25 = vsub.f32 %v1940_v29, %v1209_v7  ;;  %v1245_v12 = vadd.f32 %v1244_v63, %v1238_v3  ;;  %v1352_v55 = vld [vmem:[#allocation3 + $0x8] sm:$0xff] (!%p1502_p5)  ;;  %v1370_v63 = vld [vmem:[#allocation4 + $0x18] sm:$0xff] (!%p1502_p5)  ;;  %1377 = vst.msk [vmem:[%s2151_s9 + $0x10] sm:$0xff] (!%p1502_p5), %vm1328_vm15, %v1369_v62  ;;  %v1371_v0 = vld [vmem:[#allocation4 + $0x20] sm:$0xff] (!%p1502_p5) }
 0x630   : > { %v1241_v15 = vmul.f32 %v1233_v5, %v1233_v5  ;;  %1291 = vst [vmem:[#allocation3 + $0x28] sm:$0xff] %v1283_v6  ;;  %1307 = vst [vmem:[#allocation2 + $0x28] sm:$0xff] %v1299_v26  ;;  %v1351_v54 = vld [vmem:[#allocation3] sm:$0xff] (!%p1502_p5)  ;;  %v1372_v3 = vld [vmem:[#allocation4 + $0x28] sm:$0xff] (!%p1502_p5) }
 0x631   : > { %v1240_v16 = vmul.f32 %v1232_v9, %v1232_v9  ;;  %1290 = vst [vmem:[#allocation3 + $0x20] sm:$0xff] %v1282_v10  ;;  %1306 = vst [vmem:[#allocation2 + $0x20] sm:$0xff] %v1298_v25  ;;  %v1633_v14 = vpop.f32.mrb[6].mxu1  ;;  %v1246_v19 = vadd.f32 %v1245_v12, %v1239_v8  ;;  %v1385_v56 = vadd.f32 (!%p1502_p5), %v1352_v55, %v1351_v54  ;;  %v1373_v4 = vld [vmem:[#allocation4 + $0x30] sm:$0xff] (!%p1502_p5)  ;;  %v1374_v6 = vld [vmem:[#allocation4 + $0x38] sm:$0xff] (!%p1502_p5) }
 0x632   : > { %v1235_v30 = vsub.f32 %v1633_v14, %v1950_v34  ;;  %v1285_v20 = vadd.f32 %v1633_v14, %v1277_v11  ;;  %v1301_v17 = vsub.f32 %v1950_v34, %v1633_v14  ;;  %v1219_v23 = vpop.f32.mrb[7].mxu1  ;;  %1359 = vst [vmem:[%s2150_s8] sm:$0xff] (!%p1502_p5), %v1351_v54  ;;  %1360 = vst [vmem:[%s2150_s8 + $0x8] sm:$0xff] (!%p1502_p5), %v1352_v55 }
 0x633   : > { %v1234_v18 = vsub.f32 %v1219_v23, %v1948_v33  ;;  %v1284_v29 = vadd.f32 %v1276_v13, %v1219_v23  ;;  %v1300_v24 = vsub.f32 %v1948_v33, %v1219_v23  ;;  %1247 = vadd.xlane.f32.xlu0 %v1246_v19  ;;  %v1257_v27 = vadd.f32 %v1241_v15, %v1240_v16  ;;  %v1354_v39 = vld [vmem:[#allocation3 + $0x18] sm:$0xff] (!%p1502_p5) }
 0x634   : > { %1293 = vst [vmem:[#allocation3 + $0x38] sm:$0xff] %v1285_v20  ;;  %1309 = vst [vmem:[#allocation2 + $0x38] sm:$0xff] %v1301_v17  ;;  %v1243_v31 = vmul.f32 %v1235_v30, %v1235_v30  ;;  %v1353_v1 = vld [vmem:[#allocation3 + $0x10] sm:$0xff] (!%p1502_p5) }
 0x635   : > { %v1242_v28 = vmul.f32 %v1234_v18, %v1234_v18  ;;  %1292 = vst [vmem:[#allocation3 + $0x30] sm:$0xff] %v1284_v29  ;;  %1308 = vst [vmem:[#allocation2 + $0x30] sm:$0xff] %v1300_v24  ;;  %v1386_v61 = vadd.f32 (!%p1502_p5), %v1385_v56, %v1353_v1 }
 0x636   : > { %1361 = vst [vmem:[%s2150_s8 + $0x10] sm:$0xff] (!%p1502_p5), %v1353_v1  ;;  %1362 = vst [vmem:[%s2150_s8 + $0x18] sm:$0xff] (!%p1502_p5), %v1354_v39 }
 0x637   : > { %v1258_v32 = vadd.f32 %v1257_v27, %v1242_v28  ;;  %v1356_v58 = vld [vmem:[#allocation3 + $0x28] sm:$0xff] (!%p1502_p5)  ;;  %1378 = vst.msk [vmem:[%s2151_s9 + $0x18] sm:$0xff] (!%p1502_p5), %vm1328_vm15, %v1370_v63  ;;  %v1387_v5 = vadd.f32 (!%p1502_p5), %v1386_v61, %v1354_v39  ;;  %1379 = vst.msk [vmem:[%s2151_s9 + $0x20] sm:$0xff] (!%p1502_p5), %vm1328_vm15, %v1371_v0 }
 0x638   : > { %v1355_v57 = vld [vmem:[#allocation3 + $0x20] sm:$0xff] (!%p1502_p5)  ;;  %1364 = vst [vmem:[%s2150_s8 + $0x28] sm:$0xff] (!%p1502_p5), %v1356_v58  ;;  %1380 = vst.msk [vmem:[%s2151_s9 + $0x28] sm:$0xff] (!%p1502_p5), %vm1328_vm15, %v1372_v3 }
 0x639   : > { %v1259_v35 = vadd.f32 %v1258_v32, %v1243_v31  ;;  %1363 = vst [vmem:[%s2150_s8 + $0x20] sm:$0xff] (!%p1502_p5), %v1355_v57  ;;  %1381 = vst.msk [vmem:[%s2151_s9 + $0x30] sm:$0xff] (!%p1502_p5), %vm1328_vm15, %v1373_v4  ;;  %v1388_v7 = vrot.slane (!%p1502_p5), %v1387_v5, 4 }
 0x63a   : > { %1382 = vst.msk [vmem:[%s2151_s9 + $0x38] sm:$0xff] (!%p1502_p5), %vm1328_vm15, %v1374_v6 }
 0x63b   : > { %1260 = vadd.xlane.f32.xlu1 %v1259_v35  ;;  %v1358_v59 = vld [vmem:[#allocation3 + $0x38] sm:$0xff] (!%p1502_p5)  ;;  %v1389_v8 = vadd.f32 (!%p1502_p5), %v1388_v7, %v1387_v5 }
 0x63c   : > { %v1357_v22 = vld [vmem:[#allocation3 + $0x30] sm:$0xff] (!%p1502_p5)  ;;  %1366 = vst [vmem:[%s2150_s8 + $0x38] sm:$0xff] (!%p1502_p5), %v1358_v59 }
 0x63d   : > { %1365 = vst [vmem:[%s2150_s8 + $0x30] sm:$0xff] (!%p1502_p5), %v1357_v22  ;;  %v1390_v9 = vrot.slane (!%p1502_p5), %v1389_v8, 2 }
 0x63f   : > { %v1391_v10 = vadd.f32 (!%p1502_p5), %v1390_v9, %v1389_v8 }
 0x641   : > { %v1392_v25 = vrot.slane (!%p1502_p5), %v1391_v10, 1 }
 0x643   : > { %v1393_v11 = vadd.f32 (!%p1502_p5), %v1392_v25, %v1391_v10 }
 0x645   : > { %v1503_v12 = vmul.f32 (!%p1502_p5), -0.03125, %v1393_v11 }
 0x647   : > { %v1397_v15 = vmul.f32 (!%p1502_p5), 1.442695, %v1503_v12 }
 0x649   : > { %1724 = vpow2.f32 (!%p1502_p5), %v1397_v15 }
 0x653   : > { %v1725_v13 = vpop.eup (!%p1502_p5), %1724 }
 0x654   : > { %v1399_v16 = vadd.f32 (!%p1502_p5), 1.0, %v1725_v13 }
 0x656   : > { %1726 = vrcp.f32 (!%p1502_p5), %v1399_v16 }
 0x660   : > { %v1727_v14 = vpop.eup (!%p1502_p5), %1726 }
 0x661   : > { %1402 = vst [vmem:[%s2153_s11] sm:$0x1] (!%p1502_p5), %v1727_v14 }
 0x6c0   : > { %v1248_v36 = vpop.xlane.xlu0 %1247 }
 0x6c1   : > { %v1249_v37 = vrot.slane %v1248_v36, 4 }
 0x6c3   : > { %v1250_v34 = vadd.f32 %v1249_v37, %v1248_v36 }
 0x6c5   : > { %v1251_v38 = vrot.slane %v1250_v34, 2 }
 0x6c7   : > { %v1252_v40 = vadd.f32 %v1251_v38, %v1250_v34 }
 0x6c8   : > { %v1261_v41 = vpop.xlane.xlu1 %1260 }
 0x6c9   : > { %v1262_v42 = vrot.slane %v1261_v41, 4  ;;  %v1253_v43 = vrot.slane %v1252_v40, 1 }
 0x6cb   : > { %v1263_v33 = vadd.f32 %v1262_v42, %v1261_v41  ;;  %v1254_v44 = vadd.f32 %v1253_v43, %v1252_v40 }
 0x6cd   : > { %v1264_v45 = vrot.slane %v1263_v33, 2  ;;  %1666 = vpush %v1254_v44 }
 0x6cf   : > { %v1265_v46 = vadd.f32 %v1264_v45, %v1263_v33 }
 0x6d1   : > { %v1266_v47 = vrot.slane %v1265_v46, 1 }
 0x6d3   : > { %v1267_v48 = vadd.f32 %v1266_v47, %v1265_v46 }
 0x6d5   : > { %1668 = vpush %v1267_v48 }
 0x6fe   : > { %s1667_s23 = spop %1666 }
 0x6ff   : > { %s1256_s28 = smul.f32 0.0009765625, %s1667_s23 }
 0x701   : > { %v1340_v2 = vstv %s1256_s28 }
 0x706   : > { %s1669_s29 = spop %1668  ;;  %1350 = sbr.rel (%p1502_p5) target bundleno = 1813 (0x715), region = 52 }
 0x707   : > { %s1269_s30 = smul.f32 0.0009765625, %s1669_s29 }
 0x709   : > { %v1341_v51 = vstv %s1269_s30 }
 0x70a   : > { %v1342_v52 = vsel %vm1339_vm12, %v1340_v2, %v1341_v51 }
 0x70b   : > { %v1344_v53 = vsel %vm2007_vm14, %v1342_v52, %v1343_v50 }
 0x70c   : > { %1346 = vst.msk [vmem:[#allocation5] sm:$0x3] %vm1345_vm8, %v1344_v53 }
 0x713   : > { %v1383_v26 = vld [vmem:[#allocation5] sm:$0x3] }
 0x714   : > { %1384 = vst.msk [vmem:[%s2152_s10] sm:$0x3] %vm1345_vm8, %v1383_v26 }
 0x715 PF: > { %s22_s17 = sadd.s32 1, %s1734_s17  }
 0x716   : > { %p19_p6 = scmp.ge.s32.totalorder %s22_s17, 4  }
 0x718   :  { %21 = sbr.rel (!%p19_p6) target bundleno = 1 (0x1), region = 118 }

</bundles_post_ra>
